<compile_context>
chip_gen: v5e
topology: v5e:2x2
jax: 0.10.0
libtpu: 0.0.40
codegen_flags: <defaults>
</compile_context>

<pallas_src>
import jax
import jax.numpy as jnp
from jax import lax
from jax.experimental import pallas as pl
from jax.experimental.pallas import tpu as pltpu

EPS = 1e-5


def conv_bn_kernel(x_ref, w_ref, gb_ref, o_ref):
    # x_ref : (Cin, M)  bf16 -- whole image, resident across Cout tiles
    # w_ref : (Cin, Ct) bf16 -- Cout tile of the pre-transposed 1x1 weight
    # gb_ref: (2,  Ct)  f32  -- row 0 = gamma, row 1 = beta
    # o_ref : (Ct, M)   f32  -- NCHW-oriented output tile
    #
    # Cout on the lane axis: contract the leading (Cin) dim of the resident
    # (Cin, M) tile against (Cin, Ct)  ->  (M, Ct).  Transposed-lhs matmul,
    # f32 accumulation on the MXU.
    y = lax.dot_general(
        x_ref[...], w_ref[...],
        dimension_numbers=(((0,), (0,)), ((), ())),
        preferred_element_type=jnp.float32)               # (M, Ct)

    # Training-mode BatchNorm2d over N*H*W (= M here); numerically stable
    # two-pass form, per-channel stats as lane-dense (1, Ct) vectors.
    inv_m = jnp.float32(1.0 / y.shape[0])
    mean = jnp.sum(y, axis=0, keepdims=True) * inv_m      # (1, Ct)
    d = y - mean
    var = jnp.sum(d * d, axis=0, keepdims=True) * inv_m   # biased batch variance

    gamma = gb_ref[0:1, :]                                # (1, Ct)
    beta = gb_ref[1:2, :]                                 # (1, Ct)
    scale = gamma * lax.rsqrt(var + EPS)                  # (1, Ct)
    yn = d * scale + beta                                 # (M, Ct) lane-dense epilogue

    # Transpose the tiny (M, Ct) tile on the XLU so the store stays NCHW.
    o_ref[...] = yn.T.astype(o_ref.dtype)                 # (Ct, M)


def _default_n_tiles():
    # v7x: 2 TensorCores -> shard the two independent Cout tiles ("parallel").
    # v5e: HBM-bound     -> overlap the 2nd weight-tile DMA behind tile-0 compute.
    # v6e: single TC, ~0.35us/grid-step overhead ~ the whole DMA -> single tile.
    try:
        kind = jax.devices()[0].device_kind.lower()
    except Exception:
        return 2
    return 1 if "v6" in kind else 2


def prepare_params(w_oihw, gamma, beta, n_tiles):
    """One-time parameter packing (hoisted out of the per-call hot path)."""
    cout, cin = w_oihw.shape[0], w_oihw.shape[1]
    assert cout % n_tiles == 0
    ct = cout // n_tiles
    assert ct % 8 == 0
    # (Cout, Cin, 1, 1) -> (Cin, Cout) -> (n_tiles, Cin, Ct), bf16 (MXU-native).
    w_t = w_oihw.reshape(cout, cin).T                                  # (Cin, Cout)
    w3 = w_t.reshape(cin, n_tiles, ct).transpose(1, 0, 2).astype(jnp.bfloat16)
    # gamma/beta -> (n_tiles, 2, Ct): two contiguous lane-dense rows per tile.
    gb = jnp.stack([gamma, beta], axis=0).astype(jnp.float32)          # (2, Cout)
    gb3 = gb.reshape(2, n_tiles, ct).transpose(1, 0, 2)                # (n_tiles, 2, Ct)
    return w3, gb3


def conv2d_1x1_batchnorm(x_nchw, w3, gb3):
    """x_nchw: (1, Cin, H, W); w3: (n_tiles, Cin, Ct) bf16; gb3: (n_tiles, 2, Ct) f32."""
    n, cin, h, wd = x_nchw.shape
    n_tiles, _, ct = w3.shape
    cout = n_tiles * ct
    # TODO(synk): N>1 or a tiled H*W axis needs two-pass BN across M tiles
    # (sum/sumsq accumulators) since the stats must cover all of N*H*W.
    assert n == 1, "kernel is specialized to the module's N=1 input"
    m = h * wd

    # NCHW-native view: free reshape + activation bf16 cast (160 KB, data-dependent).
    x2d = x_nchw.reshape(cin, m).astype(jnp.bfloat16)                  # (Cin, M)

    flops = 2 * cout * cin * m
    bytes_accessed = cin * m * 2 + cin * cout * 2 + 2 * cout * 4 + cout * m * 4

    out2d = pl.pallas_call(
        conv_bn_kernel,
        out_shape=jax.ShapeDtypeStruct((cout, m), jnp.float32),
        grid=(n_tiles,),
        in_specs=[
            pl.BlockSpec((cin, m), lambda i: (0, 0)),            # X stays resident
            pl.BlockSpec((None, cin, ct), lambda i: (i, 0, 0)),  # weight Cout tile
            pl.BlockSpec((None, 2, ct), lambda i: (i, 0, 0)),    # gamma/beta tile
        ],
        out_specs=pl.BlockSpec((ct, m), lambda i: (i, 0)),
        compiler_params=pltpu.CompilerParams(
            dimension_semantics=("parallel",),
        ),
        cost_estimate=pl.CostEstimate(
            flops=flops, bytes_accessed=bytes_accessed, transcendentals=cout),
    )(x2d, w3, gb3)

    # (Cout, M) -> (1, Cout, H, W): pure reshape, no transpose.
    return out2d.reshape(n, cout, h, wd)


def reference(x_nchw, w_oihw, gamma, beta, operand_dtype=jnp.float32):
    """Pure-JAX reference (training-mode BN). operand_dtype mimics MXU input rounding."""
    n, cin, h, wd = x_nchw.shape
    cout = w_oihw.shape[0]
    x2d = x_nchw.astype(operand_dtype).astype(jnp.float32).reshape(cin, h * wd)
    w2d = w_oihw.astype(operand_dtype).astype(jnp.float32).reshape(cout, cin)
    y = jnp.dot(w2d, x2d, preferred_element_type=jnp.float32)
    mean = jnp.mean(y, axis=1, keepdims=True)
    var = jnp.mean((y - mean) ** 2, axis=1, keepdims=True)
    yn = (y - mean) * lax.rsqrt(var + EPS) * gamma.reshape(-1, 1) + beta.reshape(-1, 1)
    return yn.reshape(n, cout, h, wd)


if __name__ == "__main__":
    key = jax.random.PRNGKey(0)
    k_x, k_w, k_g, k_b = jax.random.split(key, 4)

    N, CIN, H, W = 1, 1632, 7, 7
    COUT = 272

    x = jax.random.normal(k_x, (N, CIN, H, W), dtype=jnp.float32)
    # Conv2d weight (no bias); deterministic synthetic init.
    w = jax.random.normal(k_w, (COUT, CIN, 1, 1), dtype=jnp.float32) * 0.02
    # BatchNorm affine params (default gamma=1, beta=0; perturb for coverage).
    gamma = 1.0 + 0.1 * jax.random.normal(k_g, (COUT,), dtype=jnp.float32)
    beta = 0.1 * jax.random.normal(k_b, (COUT,), dtype=jnp.float32)

    # One-time parameter prep (out of the per-call hot path).
    n_tiles = _default_n_tiles()
    w3, gb3 = jax.block_until_ready(prepare_params(w, gamma, beta, n_tiles))

    out = jax.block_until_ready(conv2d_1x1_batchnorm(x, w3, gb3))
    assert out.shape == (N, COUT, H, W), out.shape

    # Tight check against a reference using identically bf16-rounded operands
    # (isolates kernel math from the intended bf16 input quantization).
    ref_bf16 = jax.block_until_ready(reference(x, w, gamma, beta, jnp.bfloat16))
    assert jnp.allclose(out, ref_bf16, atol=1e-3, rtol=1e-3), float(
        jnp.max(jnp.abs(out - ref_bf16)))

    # Looser check against the pure-f32 module semantics (bf16 MXU inputs).
    ref_f32 = jax.block_until_ready(reference(x, w, gamma, beta, jnp.float32))
    assert jnp.allclose(out, ref_f32, atol=2e-2, rtol=2e-2), float(
        jnp.max(jnp.abs(out - ref_f32)))

    print("KERNEL_OK")
</pallas_src>

<mosaic_0001>
module attributes {stable_mosaic.version = 11 : i64} {
  func.func @conv_bn_kernel(%arg0: i32, %arg1: memref<1632x49xbf16, #tpu.memory_space<vmem>>, %arg2: memref<1x1632x136xbf16, #tpu.memory_space<vmem>>, %arg3: memref<1x2x136xf32, #tpu.memory_space<vmem>>, %arg4: memref<136x49xf32, #tpu.memory_space<vmem>>) attributes {dimension_semantics = [#tpu.dimension_semantics<parallel>], iteration_bounds = array<i64: 2>, scalar_prefetch = 0 : i64, scratch_operands = 0 : i64, tpu.core_type = #tpu.core_type<tc>, window_params = [{pipeline_mode = #tpu.pipeline_mode<synchronous>, transform_indices = @transform_0, window_bounds = array<i64: 1632, 49>}, {transform_indices = @transform_1, window_bounds = array<i64: 1, 1632, 136>}, {transform_indices = @transform_2, window_bounds = array<i64: 1, 2, 136>}, {transform_indices = @transform_3, window_bounds = array<i64: 136, 49>}]} {
    %c0 = arith.constant 0 : index
    %c0_0 = arith.constant 0 : index
    %0 = vector.load %arg1[%c0, %c0_0] : memref<1632x49xbf16, #tpu.memory_space<vmem>>, vector<1632x49xbf16>
    %c0_1 = arith.constant 0 : index
    %c0_2 = arith.constant 0 : index
    %c0_3 = arith.constant 0 : index
    %1 = vector.load %arg2[%c0_1, %c0_2, %c0_3] : memref<1x1632x136xbf16, #tpu.memory_space<vmem>>, vector<1x1632x136xbf16>
    %2 = vector.shape_cast %1 : vector<1x1632x136xbf16> to vector<1632x136xbf16>
    %cst = arith.constant dense<0.000000e+00> : vector<49x136xf32>
    %3 = tpu.matmul %0, %2, %cst {dimension_numbers = #tpu.dot_dimension_numbers<[0], [0], [1], [1], [0, 1, 1, 1], [], []>} : vector<1632x49xbf16>, vector<1632x136xbf16>, vector<49x136xf32> -> vector<49x136xf32>
    %cst_4 = arith.constant dense<0.000000e+00> : vector<136xf32>
    %4 = vector.multi_reduction <add>, %3, %cst_4 [0] : vector<49x136xf32> to vector<136xf32>
    %5 = vector.shape_cast %4 : vector<136xf32> to vector<1x136xf32>
    %cst_5 = arith.constant 0.0204081628 : f32
    %6 = vector.broadcast %cst_5 : f32 to vector<1x136xf32>
    %7 = arith.mulf %5, %6 : vector<1x136xf32>
    %8 = vector.broadcast %7 : vector<1x136xf32> to vector<49x136xf32>
    %9 = arith.subf %3, %8 : vector<49x136xf32>
    %10 = arith.mulf %9, %9 : vector<49x136xf32>
    %cst_6 = arith.constant dense<0.000000e+00> : vector<136xf32>
    %11 = vector.multi_reduction <add>, %10, %cst_6 [0] : vector<49x136xf32> to vector<136xf32>
    %12 = vector.shape_cast %11 : vector<136xf32> to vector<1x136xf32>
    %cst_7 = arith.constant 0.0204081628 : f32
    %13 = vector.broadcast %cst_7 : f32 to vector<1x136xf32>
    %14 = arith.mulf %12, %13 : vector<1x136xf32>
    %c0_8 = arith.constant 0 : index
    %c0_9 = arith.constant 0 : index
    %c0_10 = arith.constant 0 : index
    %15 = vector.load %arg3[%c0_8, %c0_9, %c0_10] : memref<1x2x136xf32, #tpu.memory_space<vmem>>, vector<1x1x136xf32>
    %16 = vector.shape_cast %15 : vector<1x1x136xf32> to vector<1x136xf32>
    %c0_11 = arith.constant 0 : index
    %c1 = arith.constant 1 : index
    %c0_12 = arith.constant 0 : index
    %17 = vector.load %arg3[%c0_11, %c1, %c0_12] : memref<1x2x136xf32, #tpu.memory_space<vmem>>, vector<1x1x136xf32>
    %18 = vector.shape_cast %17 : vector<1x1x136xf32> to vector<1x136xf32>
    %cst_13 = arith.constant 9.99999974E-6 : f32
    %19 = vector.broadcast %cst_13 : f32 to vector<1x136xf32>
    %20 = arith.addf %14, %19 : vector<1x136xf32>
    %21 = math.rsqrt %20 : vector<1x136xf32>
    %22 = arith.mulf %16, %21 : vector<1x136xf32>
    %23 = vector.broadcast %22 : vector<1x136xf32> to vector<49x136xf32>
    %24 = arith.mulf %9, %23 : vector<49x136xf32>
    %25 = vector.broadcast %18 : vector<1x136xf32> to vector<49x136xf32>
    %26 = arith.addf %24, %25 : vector<49x136xf32>
    %27 = tpu.transpose %26, [1, 0] : vector<49x136xf32> -> vector<136x49xf32>
    %c0_14 = arith.constant 0 : index
    %c0_15 = arith.constant 0 : index
    %28 = vector.load %arg4[%c0_14, %c0_15] : memref<136x49xf32, #tpu.memory_space<vmem>>, vector<136x49xf32>
    tpu.vector_store %arg4[%c0_14, %c0_15], %27 {strides = array<i32>} : memref<136x49xf32, #tpu.memory_space<vmem>>, vector<136x49xf32>,
    return
  }
  func.func @transform_0(%arg0: i32) -> (i32, i32) {
    %c0_i32 = arith.constant 0 : i32
    %c0_i32_0 = arith.constant 0 : i32
    %c0_i32_1 = arith.constant 0 : i32
    return %c0_i32, %c0_i32_0 : i32, i32
  }
  func.func @transform_1(%arg0: i32) -> (i32, i32, i32) {
    %c0_i32 = arith.constant 0 : i32
    %c0_i32_0 = arith.constant 0 : i32
    %c0_i32_1 = arith.constant 0 : i32
    return %arg0, %c0_i32, %c0_i32_0 : i32, i32, i32
  }
  func.func @transform_2(%arg0: i32) -> (i32, i32, i32) {
    %c0_i32 = arith.constant 0 : i32
    %c0_i32_0 = arith.constant 0 : i32
    %c0_i32_1 = arith.constant 0 : i32
    return %arg0, %c0_i32, %c0_i32_0 : i32, i32, i32
  }
  func.func @transform_3(%arg0: i32) -> (i32, i32) {
    %c0_i32 = arith.constant 0 : i32
    %c0_i32_0 = arith.constant 0 : i32
    return %arg0, %c0_i32 : i32, i32
  }
}

</mosaic_0001>

<bundles_post_ra>
// kernel: tpu_custom_call.1
= control target key start
LH: loop header
LB: loop body
LE: loop exit
PB: predicated region body
PF: predicated region fallthrough
CT: control target
= control target key end

     0   :  { %s5414_s12 = smov 0   ;;  %s6778_s0 = inlined_call_operand.vmem [shape: bf16[1632,49], index: 0, kind: input, shape index: {}]   ;;  %s6779_s1 = inlined_call_operand.vmem [shape: bf16[2,1632,136], index: 1, kind: input, shape index: {}]   ;;  %s6780_s2 = inlined_call_operand.vmem [shape: f32[2,2,136], index: 2, kind: input, shape index: {}]   ;;  %s6781_s3 = inlined_call_operand.vmem [shape: f32[272,49], index: 3, kind: output, shape index: {}]  }
   0x1 LB: > { %s5420_s13 = sadd.s32 4294967295, %s5381_s12   ;;  %p3504_p0 = scmp.ge.s32.totalorder %s5381_s12, 1  ;;  %s5381_s12 = sphi %s5414_s12, %s13_s12  }
   0x2   : > { %p147_p1 = scmp.lt.s32.totalorder %s5381_s12, 3 }
   0x4   : > { %p148_p2 = pnand %p3504_p0, %p147_p1 }
   0x5   : > { %p176_p3 = scmp.lt.s32.totalorder (!%p148_p2), %s5420_s13, 1 }
   0x6   : > { %151 = sbr.rel (%p148_p2) target bundleno = 1143 (0x477), region = 32 }
   0xb   : > { %v4745_v0 = vld [vmem:[%s6778_s0] sm:$0xff]  ;;  %v4746_v2 = vld [vmem:[%s6778_s0 + $0x8] sm:$0xff]  ;;  %v4747_v4 = vld [vmem:[%s6778_s0 + $0x10] sm:$0xff]  ;;  %s5462_s11 = scalar_select %p176_p3, %s5420_s13, 1  ;;  %vm2441_vm0 = vcmask 785408   ;;  %vm3187_vm1 = vcmask 1040384  }
   0xc   : > { %v4753_v1 = vld [vmem:[%s6778_s0 + $0x40] sm:$0xff]  ;;  %v4754_v3 = vld [vmem:[%s6778_s0 + $0x48] sm:$0xff]  ;;  %v4755_v5 = vld [vmem:[%s6778_s0 + $0x50] sm:$0xff]  ;;  %vm3196_vm2 = vcmask 64512   ;;  %vm3208_vm3 = vcmask 57344   ;;  %vm3414_vm10 = vcmask 400384  }
   0xd   : > { %5313 = vxpose.binary.xlu0.c.b16.start [1/16] (narrow) %v4753_v1, %v4745_v0, 64  ;;  %v4748_v6 = vld [vmem:[%s6778_s0 + $0x18] sm:$0xff]  ;;  %v4749_v8 = vld [vmem:[%s6778_s0 + $0x20] sm:$0xff]  ;;  %s5302_s14 = smul.u32 1632, %s5462_s11  ;;  %v4750_v12 = vld [vmem:[%s6778_s0 + $0x28] sm:$0xff] }
   0xe   : > { %v4756_v7 = vld [vmem:[%s6778_s0 + $0x58] sm:$0xff]  ;;  %v4757_v9 = vld [vmem:[%s6778_s0 + $0x60] sm:$0xff]  ;;  %v4758_v13 = vld [vmem:[%s6778_s0 + $0x68] sm:$0xff] }
   0xf   : > { %v4809_v10 = vld [vmem:[%s6778_s0 + $0x200] sm:$0xff]  ;;  %s5474_s21 = scalar_lea.vmem %s6779_s1, %s5302_s14  ;;  %v4810_v14 = vld [vmem:[%s6778_s0 + $0x208] sm:$0xff]  ;;  %v5493_v20 = vld [vmem:[%s6778_s0 + $0x138] sm:$0xff] }
  0x10   : > { %v4817_v11 = vld [vmem:[%s6778_s0 + $0x240] sm:$0xff]  ;;  %v4818_v15 = vld [vmem:[%s6778_s0 + $0x248] sm:$0xff]  ;;  %v3975_v18 = vld [vmem:[%s5474_s21 + $0x70] sm:$0xf]  ;;  %5082 = vmatpush.lsf.bf16.msrb.mxu0 %v5493_v20 }
  0x11   : > { %5345 = vxpose.binary.xlu2.c.b16.start [1/16] (narrow) %v4817_v11, %v4809_v10, 64  ;;  %v4793_v16 = vld [vmem:[%s6778_s0 + $0x180] sm:$0xff]  ;;  %v4862_v19 = vld [vmem:[%s5474_s21 + $0x74] sm:$0xf0]  ;;  %v4860_v23 = vld [vmem:[%s5474_s21 + $0x64] sm:$0xf0] }
  0x12   : > { %v4801_v17 = vld [vmem:[%s6778_s0 + $0x1c0] sm:$0xff]  ;;  %v3976_v21 = vor.u32 %v4862_v19, %v3975_v18  ;;  %v5501_v24 = vld [vmem:[%s6778_s0 + $0x130] sm:$0xff]  ;;  %v4878_v27 = vld [vmem:[%s5474_s21 + $0xf4] sm:$0xf0] }
  0x13   : > { %5329 = vxpose.binary.xlu1.c.b16.start [1/16] (narrow) %v4801_v17, %v4793_v16, 64  ;;  %v3967_v22 = vld [vmem:[%s5474_s21 + $0x60] sm:$0xf]  ;;  %v4039_v26 = vld [vmem:[%s5474_s21 + $0xf0] sm:$0xf]  ;;  %v4792_v31 = vld [vmem:[%s6778_s0 + $0x178] sm:$0xff] }
  0x14   : > { %2454 = vmatpush.bf16.msra.mxu0 %v3976_v21  ;;  %v3968_v25 = vor.u32 %v4860_v23, %v3967_v22  ;;  %5051 = vmatpush.bf16.msra.mxu2 %v3976_v21  ;;  %v3959_v28 = vld [vmem:[%s5474_s21 + $0x50] sm:$0xf]  ;;  %v4858_v29 = vld [vmem:[%s5474_s21 + $0x54] sm:$0xf0]  ;;  %v4040_v30 = vor.u32 %v4878_v27, %v4039_v26  ;;  %v4031_v32 = vld [vmem:[%s5474_s21 + $0xe0] sm:$0xf] }
  0x15   : > { %v4876_v33 = vld [vmem:[%s5474_s21 + $0xe4] sm:$0xf0]  ;;  %v3960_v36 = vor.u32 %v4858_v29, %v3959_v28  ;;  %v3951_v37 = vld [vmem:[%s5474_s21 + $0x40] sm:$0xf]  ;;  %v4791_v38 = vld [vmem:[%s6778_s0 + $0x170] sm:$0xff] }
  0x16   : > { %2482 = vmatpush.bf16.msra.mxu1 %v4040_v30  ;;  %v5516_v34 = vld [vmem:[%s6778_s0 + $0x128] sm:$0xff]  ;;  %v4032_v35 = vor.u32 %v4876_v33, %v4031_v32  ;;  %v4023_v40 = vld [vmem:[%s5474_s21 + $0xd0] sm:$0xf]  ;;  %v4874_v41 = vld [vmem:[%s5474_s21 + $0xd4] sm:$0xf0]  ;;  %5059 = vmatpush.bf16.msra.mxu3 %v4040_v30 }
  0x17   : > { %v4856_v39 = vld [vmem:[%s5474_s21 + $0x44] sm:$0xf0]  ;;  %v4751_v42 = vld [vmem:[%s6778_s0 + $0x30] sm:$0xff]  ;;  %v4024_v46 = vor.u32 %v4874_v41, %v4023_v40  ;;  %v4854_v49 = vld [vmem:[%s5474_s21 + $0x34] sm:$0xf0] }
  0x18   : > { %5083 = vmatpush.lsf.bf16.msrb.mxu0 %v5501_v24  ;;  %5052 = vmatpush.bf16.msra.mxu2 %v3968_v25  ;;  %v4759_v43 = vld [vmem:[%s6778_s0 + $0x70] sm:$0xff]  ;;  %v3952_v45 = vor.u32 %v4856_v39, %v3951_v37  ;;  %v4794_v50 = vld [vmem:[%s6778_s0 + $0x188] sm:$0xff]  ;;  %v5549_v52 = vld [vmem:[%s6778_s0 + $0x120] sm:$0xff] }
  0x19   : > { %v4811_v44 = vld [vmem:[%s6778_s0 + $0x210] sm:$0xff]  ;;  %v4802_v51 = vld [vmem:[%s6778_s0 + $0x1c8] sm:$0xff]  ;;  %v4015_v55 = vld [vmem:[%s5474_s21 + $0xc0] sm:$0xf] }
  0x1a   : > { %5142 = vmatpush.lsf.bf16.msrb.mxu1 %v4792_v31  ;;  %v4819_v47 = vld [vmem:[%s6778_s0 + $0x250] sm:$0xff]  ;;  %5060 = vmatpush.bf16.msra.mxu3 %v4032_v35  ;;  %v4790_v53 = vld [vmem:[%s6778_s0 + $0x168] sm:$0xff]  ;;  %v3935_v57 = vld [vmem:[%s5474_s21 + $0x20] sm:$0xf] }
  0x1b   : > { %v3943_v48 = vld [vmem:[%s5474_s21 + $0x30] sm:$0xf]  ;;  %v4872_v56 = vld [vmem:[%s5474_s21 + $0xc4] sm:$0xf0]  ;;  %v4870_v61 = vld [vmem:[%s5474_s21 + $0xb4] sm:$0xf0] }
  0x1c   : > { %2455 = vmatpush.bf16.msra.mxu0 %v3968_v25  ;;  %5053 = vmatpush.bf16.msra.mxu2 %v3960_v36  ;;  %v3944_v54 = vor.u32 %v4854_v49, %v3943_v48  ;;  %v4852_v58 = vld [vmem:[%s5474_s21 + $0x24] sm:$0xf0]  ;;  %v4016_v59 = vor.u32 %v4872_v56, %v4015_v55  ;;  %v4007_v60 = vld [vmem:[%s5474_s21 + $0xb0] sm:$0xf]  ;;  %v5564_v62 = vld [vmem:[%s6778_s0 + $0x118] sm:$0xff] }
  0x1d   : > { %5314 = vxpose.binary.xlu0.c.b16.cont [2/16] (narrow) %v4754_v3, %v4746_v2, 64  ;;  %v4789_v63 = vld [vmem:[%s6778_s0 + $0x160] sm:$0xff]  ;;  %v3936_v0 = vor.u32 %v4852_v58, %v3935_v57  ;;  %v3927_v1 = vld [vmem:[%s5474_s21 + $0x10] sm:$0xf]  ;;  %v4008_v2 = vor.u32 %v4870_v61, %v4007_v60  ;;  %v4850_v3 = vld [vmem:[%s5474_s21 + $0x14] sm:$0xf0] }
  0x1e   : > { %2483 = vmatpush.bf16.msra.mxu1 %v4032_v35  ;;  %5061 = vmatpush.bf16.msra.mxu3 %v4024_v46  ;;  %v4752_v10 = vld [vmem:[%s6778_s0 + $0x38] sm:$0xff]  ;;  %v4795_v18 = vld [vmem:[%s6778_s0 + $0x190] sm:$0xff]  ;;  %v5615_v22 = vld [vmem:[%s6778_s0 + $0x100] sm:$0xff] }
  0x1f   : > { %v4760_v11 = vld [vmem:[%s6778_s0 + $0x78] sm:$0xff]  ;;  %v4803_v19 = vld [vmem:[%s6778_s0 + $0x1d0] sm:$0xff]  ;;  %v4841_v23 = vld [vmem:[%s6778_s0 + $0x300] sm:$0xff] }
  0x20   : > { %5084 = vmatpush.lsf.bf16.msrb.mxu0 %v5516_v34  ;;  %5054 = vmatpush.bf16.msra.mxu2 %v3952_v45  ;;  %v4812_v16 = vld [vmem:[%s6778_s0 + $0x218] sm:$0xff]  ;;  %v4813_v25 = vld [vmem:[%s6778_s0 + $0x220] sm:$0xff]  ;;  %v3991_v27 = vld [vmem:[%s5474_s21 + $0x90] sm:$0xf] }
  0x21   : > { %5346 = vxpose.binary.xlu2.c.b16.cont [2/16] (narrow) %v4818_v15, %v4810_v14, 64  ;;  %v4848_v14 = vld [vmem:[%s5474_s21 + $0x4] sm:$0xf0]  ;;  %v4787_v15 = vld [vmem:[%s6778_s0 + $0x150] sm:$0xff]  ;;  %v4820_v17 = vld [vmem:[%s6778_s0 + $0x258] sm:$0xff] }
  0x22   : > { %5143 = vmatpush.lsf.bf16.msrb.mxu1 %v4791_v38  ;;  %5062 = vmatpush.bf16.msra.mxu3 %v4016_v59  ;;  %v4821_v26 = vld [vmem:[%s6778_s0 + $0x260] sm:$0xff]  ;;  %v4866_v28 = vld [vmem:[%s5474_s21 + $0x94] sm:$0xf0]  ;;  %v4786_v31 = vld [vmem:[%s6778_s0 + $0x148] sm:$0xff] }
  0x23   : > { %5330 = vxpose.binary.xlu1.c.b16.cont [2/16] (narrow) %v4802_v51, %v4794_v50, 64  ;;  %v3992_v29 = vor.u32 %v4866_v28, %v3991_v27  ;;  %v4768_v30 = vld [vmem:[%s6778_s0 + $0xb8] sm:$0xff]  ;;  %v4842_v35 = vld [vmem:[%s6778_s0 + $0x308] sm:$0xff]  ;;  %v4767_v38 = vld [vmem:[%s6778_s0 + $0xb0] sm:$0xff] }
  0x24   : > { %2456 = vmatpush.bf16.msra.mxu0 %v3960_v36  ;;  %5055 = vmatpush.bf16.msra.mxu2 %v3944_v54  ;;  %v4796_v32 = vld [vmem:[%s6778_s0 + $0x198] sm:$0xff]  ;;  %v3983_v36 = vld [vmem:[%s5474_s21 + $0x80] sm:$0xf]  ;;  %v4864_v37 = vld [vmem:[%s5474_s21 + $0x84] sm:$0xf0] }
  0x25   : > { %v4804_v33 = vld [vmem:[%s6778_s0 + $0x1d8] sm:$0xff]  ;;  %v3984_v39 = vor.u32 %v4864_v37, %v3983_v36  ;;  %v4785_v40 = vld [vmem:[%s6778_s0 + $0x140] sm:$0xff]  ;;  %v5655_v41 = vld [vmem:[%s6778_s0 + $0xa8] sm:$0xff] }
  0x26   : > { %2484 = vmatpush.bf16.msra.mxu1 %v4024_v46  ;;  %5063 = vmatpush.bf16.msra.mxu3 %v4008_v2  ;;  %v4822_v46 = vld [vmem:[%s6778_s0 + $0x268] sm:$0xff]  ;;  %v4797_v48 = vld [vmem:[%s6778_s0 + $0x1a0] sm:$0xff]  ;;  %v4843_v50 = vld [vmem:[%s6778_s0 + $0x310] sm:$0xff] }
  0x27   : > { %v4805_v49 = vld [vmem:[%s6778_s0 + $0x1e0] sm:$0xff]  ;;  %v4231_v56 = vld [vmem:[%s5474_s21 + $0x270] sm:$0xf]  ;;  %v4926_v57 = vld [vmem:[%s5474_s21 + $0x274] sm:$0xf0] }
  0x28   : > { %2457 = vmatpush.bf16.msra.mxu0 %v3952_v45  ;;  %5056 = vmatpush.bf16.msra.mxu2 %v3936_v0  ;;  %v4814_v45 = vld [vmem:[%s6778_s0 + $0x228] sm:$0xff]  ;;  %v4773_v51 = vld [vmem:[%s6778_s0 + $0xe0] sm:$0xff]  ;;  %v4815_v58 = vld [vmem:[%s6778_s0 + $0x230] sm:$0xff]  ;;  %v4232_v60 = vor.u32 %v4926_v57, %v4231_v56 }
  0x29   : > { %v5718_v55 = vld [vmem:[%s6778_s0 + $0x80] sm:$0xff]  ;;  %v4103_v56 = vld [vmem:[%s5474_s21 + $0x170] sm:$0xf]  ;;  %v4894_v57 = vld [vmem:[%s5474_s21 + $0x174] sm:$0xf0] }
  0x2a   : > { %5144 = vmatpush.lsf.bf16.msrb.mxu1 %v4790_v53  ;;  %v5709_v53 = vld [vmem:[%s6778_s0 + $0x88] sm:$0xff]  ;;  %v4223_v61 = vld [vmem:[%s5474_s21 + $0x260] sm:$0xf] }
  0x2b   : > { %v4191_v28 = vld [vmem:[%s5474_s21 + $0x220] sm:$0xf] }
  0x2c   : > { %5085 = vmatpush.lsf.bf16.msrb.mxu0 %v5549_v52 }
  0x2d   : > { %5315 = vxpose.binary.xlu0.c.b16.cont [3/16] (narrow) %v4755_v5, %v4747_v4, 64  ;;  %v3999_v4 = vld [vmem:[%s5474_s21 + $0xa0] sm:$0xf]  ;;  %v4868_v5 = vld [vmem:[%s5474_s21 + $0xa4] sm:$0xf0] }
  0x2e   : > { %2485 = vmatpush.bf16.msra.mxu1 %v4016_v59  ;;  %v4823_v59 = vld [vmem:[%s6778_s0 + $0x270] sm:$0xff] }
  0x30   : > { %2458 = vmatpush.bf16.msra.mxu0 %v3944_v54  ;;  %v4772_v54 = vld [vmem:[%s6778_s0 + $0xd8] sm:$0xff] }
  0x31   : > { %5347 = vxpose.binary.xlu2.c.b16.cont [3/16] (narrow) %v4819_v47, %v4811_v44, 64  ;;  %v4775_v44 = vld [vmem:[%s6778_s0 + $0xf0] sm:$0xff]  ;;  %v5680_v47 = vld [vmem:[%s6778_s0 + $0x98] sm:$0xff] }
  0x32   : > { %5145 = vmatpush.lsf.bf16.msrb.mxu1 %v4789_v63  ;;  %v4924_v63 = vld [vmem:[%s5474_s21 + $0x264] sm:$0xf0] }
  0x33   : > { %5331 = vxpose.binary.xlu1.c.b16.cont [3/16] (narrow) %v4803_v19, %v4795_v18, 64  ;;  %v4199_v19 = vld [vmem:[%s5474_s21 + $0x230] sm:$0xf] }
  0x34   : > { %5086 = vmatpush.lsf.bf16.msrb.mxu0 %v5564_v62 }
  0x36   : > { %2486 = vmatpush.bf16.msra.mxu1 %v4008_v2  ;;  %v4224_v2 = vor.u32 %v4924_v63, %v4223_v61  ;;  %v4095_v63 = vld [vmem:[%s5474_s21 + $0x160] sm:$0xf] }
  0x38   : > { %2459 = vmatpush.bf16.msra.mxu0 %v3936_v0  ;;  %v4770_v0 = vld [vmem:[%s6778_s0 + $0xc8] sm:$0xff] }
  0x3d   : > { %5316 = vxpose.binary.xlu0.c.b16.cont [4/16] (narrow) %v4756_v7, %v4748_v6, 64  ;;  %v5577_v6 = vld [vmem:[%s6778_s0 + $0x110] sm:$0xff]  ;;  %v4788_v7 = vld [vmem:[%s6778_s0 + $0x158] sm:$0xff] }
  0x3e   : > { %5087 = vmatpush.lsf.bf16.msrb.mxu0 %v5577_v6  ;;  %5146 = vmatpush.lsf.bf16.msrb.mxu1 %v4788_v7  ;;  %v4295_v7 = vld [vmem:[%s5474_s21 + $0x2f0] sm:$0xf] }
  0x41   : > { %5348 = vxpose.binary.xlu2.c.b16.cont [4/16] (narrow) %v4820_v17, %v4812_v16, 64  ;;  %v4940_v16 = vld [vmem:[%s5474_s21 + $0x2e4] sm:$0xf0] }
  0x43   : > { %5332 = vxpose.binary.xlu1.c.b16.cont [4/16] (narrow) %v4804_v33, %v4796_v32, 64  ;;  %v4271_v32 = vld [vmem:[%s5474_s21 + $0x2c0] sm:$0xf]  ;;  %v4936_v33 = vld [vmem:[%s5474_s21 + $0x2c4] sm:$0xf0] }
  0x44   : > { %v4272_v37 = vor.u32 %v4936_v33, %v4271_v32  ;;  %v4551_v32 = vld [vmem:[%s5474_s21 + $0x4f0] sm:$0xf] }
  0x4d   : > { %5317 = vxpose.binary.xlu0.c.b16.cont [5/16] (narrow) %v4757_v9, %v4749_v8, 64  ;;  %v3928_v8 = vor.u32 %v4850_v3, %v3927_v1  ;;  %v4000_v9 = vor.u32 %v4868_v5, %v3999_v4  ;;  %v4215_v1 = vld [vmem:[%s5474_s21 + $0x250] sm:$0xf]  ;;  %v4798_v3 = vld [vmem:[%s6778_s0 + $0x1a8] sm:$0xff]  ;;  %v4922_v5 = vld [vmem:[%s5474_s21 + $0x254] sm:$0xf0] }
  0x4e   : > { %v4806_v4 = vld [vmem:[%s6778_s0 + $0x1e8] sm:$0xff] }
  0x4f   : > { %2460 = vmatpush.bf16.msra.mxu0 %v3928_v8  ;;  %2487 = vmatpush.bf16.msra.mxu1 %v4000_v9 }
  0x50   : > { %5057 = vmatpush.bf16.msra.mxu2 %v3928_v8  ;;  %5064 = vmatpush.bf16.msra.mxu3 %v4000_v9  ;;  %v4942_v8 = vld [vmem:[%s5474_s21 + $0x2f4] sm:$0xf0]  ;;  %v4769_v9 = vld [vmem:[%s6778_s0 + $0xc0] sm:$0xff] }
  0x51   : > { %5349 = vxpose.binary.xlu2.c.b16.cont [5/16] (narrow) %v4821_v26, %v4813_v25, 64  ;;  %v4938_v25 = vld [vmem:[%s5474_s21 + $0x2d4] sm:$0xf0] }
  0x53   : > { %5147 = vmatpush.lsf.bf16.msrb.mxu1 %v4787_v15  ;;  %v4287_v15 = vld [vmem:[%s5474_s21 + $0x2e0] sm:$0xf] }
  0x54   : > { %5065 = vmatpush.bf16.msra.mxu3 %v3992_v29  ;;  %v4288_v18 = vor.u32 %v4940_v16, %v4287_v15  ;;  %v4087_v15 = vld [vmem:[%s5474_s21 + $0x150] sm:$0xf]  ;;  %v4890_v16 = vld [vmem:[%s5474_s21 + $0x154] sm:$0xf0] }
  0x55   : > { %5333 = vxpose.binary.xlu1.c.b16.cont [5/16] (narrow) %v4805_v49, %v4797_v48, 64  ;;  %v4912_v48 = vld [vmem:[%s5474_s21 + $0x204] sm:$0xf0]  ;;  %v4255_v49 = vld [vmem:[%s5474_s21 + $0x2a0] sm:$0xf] }
  0x57   : > { %2488 = vmatpush.bf16.msra.mxu1 %v3992_v29  ;;  %v4816_v29 = vld [vmem:[%s6778_s0 + $0x238] sm:$0xff] }
  0x58   : > { %5066 = vmatpush.bf16.msra.mxu3 %v3984_v39 }
  0x5b   : > { %5148 = vmatpush.lsf.bf16.msrb.mxu1 %v4786_v31  ;;  %v4916_v31 = vld [vmem:[%s5474_s21 + $0x224] sm:$0xf0] }
  0x5c   : > { %v4192_v36 = vor.u32 %v4916_v31, %v4191_v28  ;;  %v4079_v28 = vld [vmem:[%s5474_s21 + $0x140] sm:$0xf]  ;;  %v4986_v31 = vld [vmem:[%s5474_s21 + $0x454] sm:$0xf0] }
  0x5d   : > { %5318 = vxpose.binary.xlu0.c.b16.cont [6/16] (narrow) %v4758_v13, %v4750_v12, 64  ;;  %v5592_v12 = vld [vmem:[%s6778_s0 + $0x108] sm:$0xff]  ;;  %v3919_v13 = vld [vmem:[%s5474_s21] sm:$0xf] }
  0x5e   : > { %v3920_v21 = vor.u32 %v4848_v14, %v3919_v13  ;;  %5088 = vmatpush.lsf.bf16.msrb.mxu0 %v5592_v12  ;;  %v4207_v13 = vld [vmem:[%s5474_s21 + $0x240] sm:$0xf]  ;;  %v4920_v14 = vld [vmem:[%s5474_s21 + $0x244] sm:$0xf0] }
  0x5f   : > { %2489 = vmatpush.bf16.msra.mxu1 %v3984_v39  ;;  %v4263_v39 = vld [vmem:[%s5474_s21 + $0x2b0] sm:$0xf] }
  0x60   : > { %5058 = vmatpush.bf16.msra.mxu2 %v3920_v21 }
  0x61   : > { %5350 = vxpose.binary.xlu2.c.b16.cont [6/16] (narrow) %v4822_v46, %v4814_v45, 64 }
  0x62   : > { %2461 = vmatpush.bf16.msra.mxu0 %v3920_v21  ;;  %v4918_v21 = vld [vmem:[%s5474_s21 + $0x234] sm:$0xf0] }
  0x63   : > { %5149 = vmatpush.lsf.bf16.msrb.mxu1 %v4785_v40  ;;  %v4200_v26 = vor.u32 %v4918_v21, %v4199_v19  ;;  %v4934_v40 = vld [vmem:[%s5474_s21 + $0x2b4] sm:$0xf0] }
  0x64   : > { %5188 = vmatpush.lsf.bf16.msrb.mxu2 %v4768_v30  ;;  %v4824_v30 = vld [vmem:[%s6778_s0 + $0x278] sm:$0xff]  ;;  %v4264_v46 = vor.u32 %v4934_v40, %v4263_v39  ;;  %v4071_v40 = vld [vmem:[%s5474_s21 + $0x130] sm:$0xf] }
  0x65   : > { %5150 = vllmr.8.mxu1 }
  0x66   : > { %5089 = vmatpush.lsf.bf16.msrb.mxu0 %v5615_v22 }
  0x67   : > { %5159 = vmatpush.lsf.bf16.msrb.mxu1 %v5493_v20  ;;  %v4774_v20 = vld [vmem:[%s6778_s0 + $0xe8] sm:$0xff] }
  0x68   : > { %5090 = vllmr.8.mxu0  ;;  %5189 = vmatpush.lsf.bf16.msrb.mxu2 %v4767_v38  ;;  %v4914_v38 = vld [vmem:[%s5474_s21 + $0x214] sm:$0xf0] }
  0x69   : > { %5334 = vxpose.binary.xlu1.c.b16.cont [6/16] (narrow) %v4806_v4, %v4798_v3, 64  ;;  %v4487_v4 = vld [vmem:[%s5474_s21 + $0x470] sm:$0xf] }
  0x6b   : > { %5160 = vmatpush.lsf.bf16.msrb.mxu1 %v5501_v24  ;;  %v5699_v24 = vld [vmem:[%s6778_s0 + $0x90] sm:$0xff] }
  0x6c   : > { %5190 = vmatpush.lsf.bf16.msrb.mxu2 %v5655_v41 }
  0x6d   : > { %5319 = vxpose.binary.xlu0.c.b16.cont [7/16] (narrow) %v4759_v43, %v4751_v42, 64  ;;  %v4776_v42 = vld [vmem:[%s6778_s0 + $0xf8] sm:$0xff]  ;;  %v5664_v43 = vld [vmem:[%s6778_s0 + $0xa0] sm:$0xff] }
  0x6e   : > { %5251 = vmatpush.lsf.bf16.msrb.mxu3 %v4776_v42  ;;  %5099 = vmatpush.lsf.bf16.msrb.mxu0 %v4776_v42  ;;  %v4807_v42 = vld [vmem:[%s6778_s0 + $0x1f0] sm:$0xff] }
  0x6f   : > { %5161 = vmatpush.lsf.bf16.msrb.mxu1 %v5516_v34  ;;  %v4771_v34 = vld [vmem:[%s6778_s0 + $0xd0] sm:$0xff] }
  0x70   : > { %5191 = vmatpush.lsf.bf16.msrb.mxu2 %v5664_v43 }
  0x71   : > { %5351 = vxpose.binary.xlu2.c.b16.cont [7/16] (narrow) %v4823_v59, %v4815_v58, 64  ;;  %v4247_v58 = vld [vmem:[%s5474_s21 + $0x290] sm:$0xf]  ;;  %v4930_v59 = vld [vmem:[%s5474_s21 + $0x294] sm:$0xf0] }
  0x72   : > { %5252 = vmatpush.lsf.bf16.msrb.mxu3 %v4775_v44  ;;  %5100 = vmatpush.lsf.bf16.msrb.mxu0 %v4775_v44  ;;  %v4845_v44 = vld [vmem:[%s6778_s0 + $0x320] sm:$0xff]  ;;  %v4248_v61 = vor.u32 %v4930_v59, %v4247_v58  ;;  %v4884_v59 = vld [vmem:[%s5474_s21 + $0x124] sm:$0xf0] }
  0x73   : > { %5162 = vmatpush.lsf.bf16.msrb.mxu1 %v5549_v52  ;;  %v4063_v58 = vld [vmem:[%s5474_s21 + $0x120] sm:$0xf] }
  0x74   : > { %5192 = vmatpush.lsf.bf16.msrb.mxu2 %v5680_v47 }
  0x76   : > { %5253 = vmatpush.lsf.bf16.msrb.mxu3 %v4774_v20  ;;  %5101 = vmatpush.lsf.bf16.msrb.mxu0 %v4774_v20  ;;  %v4175_v20 = vld [vmem:[%s5474_s21 + $0x200] sm:$0xf] }
  0x77   : > { %5163 = vmatpush.lsf.bf16.msrb.mxu1 %v5564_v62  ;;  %v4844_v62 = vld [vmem:[%s6778_s0 + $0x318] sm:$0xff] }
  0x78   : > { %5193 = vmatpush.lsf.bf16.msrb.mxu2 %v5699_v24 }
  0x7a   : > { %5254 = vmatpush.lsf.bf16.msrb.mxu3 %v4773_v51  ;;  %5102 = vmatpush.lsf.bf16.msrb.mxu0 %v4773_v51 }
  0x7b   : > { %5164 = vmatpush.lsf.bf16.msrb.mxu1 %v5577_v6  ;;  %v4208_v6 = vor.u32 %v4920_v14, %v4207_v13  ;;  %v4808_v13 = vld [vmem:[%s6778_s0 + $0x1f8] sm:$0xff]  ;;  %v4846_v14 = vld [vmem:[%s6778_s0 + $0x328] sm:$0xff] }
  0x7c   : > { %5194 = vmatpush.lsf.bf16.msrb.mxu2 %v5709_v53 }
  0x7d   : > { %5320 = vxpose.binary.xlu0.c.b16.end [8/16] (narrow) %v4760_v11, %v4752_v10, 64  ;;  %v4216_v10 = vor.u32 %v4922_v5, %v4215_v1  ;;  %v4296_v11 = vor.u32 %v4942_v8, %v4295_v7  ;;  %v4239_v1 = vld [vmem:[%s5474_s21 + $0x280] sm:$0xf]  ;;  %v4167_v8 = vld [vmem:[%s5474_s21 + $0x1f0] sm:$0xf] }
  0x7e   : > { %5255 = vmatpush.lsf.bf16.msrb.mxu3 %v4772_v54  ;;  %5103 = vmatpush.lsf.bf16.msrb.mxu0 %v4772_v54  ;;  %v4176_v54 = vor.u32 %v4912_v48, %v4175_v20  ;;  %v5004_v20 = vld [vmem:[%s5474_s21 + $0x4e4] sm:$0xf0] }
  0x80   : > { %5195 = vmatpush.lsf.bf16.msrb.mxu2 %v5718_v55 }
  0x81   : > { %5352 = vxpose.binary.xlu2.c.b16.end [8/16] (narrow) %v4824_v30, %v4816_v29, 64  ;;  %v4888_v29 = vld [vmem:[%s5474_s21 + $0x144] sm:$0xf0]  ;;  %v4471_v30 = vld [vmem:[%s5474_s21 + $0x450] sm:$0xf] }
  0x82   : > { %5256 = vmatpush.lsf.bf16.msrb.mxu3 %v4771_v34  ;;  %5196 = vllmr.8.mxu2  ;;  %v4080_v39 = vor.u32 %v4888_v29, %v4079_v28  ;;  %v4978_v28 = vld [vmem:[%s5474_s21 + $0x414] sm:$0xf0]  ;;  %v4519_v29 = vld [vmem:[%s5474_s21 + $0x4b0] sm:$0xf] }
  0x86   : > { %5257 = vmatpush.lsf.bf16.msrb.mxu3 %v4770_v0 }
  0x8a   : > { %5258 = vmatpush.lsf.bf16.msrb.mxu3 %v4769_v9 }
  0x8c   : > { %5259 = vllmr.8.mxu3 }
  0x8d   : > { %1405 = vxpose.xlu0.c.b16.start [1/6] (short) (narrow) %v4841_v23, 64  ;;  %v4279_v23 = vld [vmem:[%s5474_s21 + $0x2d0] sm:$0xf] }
  0x8e   : > { %v4280_v27 = vor.u32 %v4938_v25, %v4279_v23  ;;  %v4088_v23 = vor.u32 %v4890_v16, %v4087_v15  ;;  %v4159_v25 = vld [vmem:[%s5474_s21 + $0x1e0] sm:$0xf] }
  0x9d   : > { %1406 = vxpose.xlu0.c.b16.cont [2/6] (short) (narrow) %v4842_v35, 64  ;;  %v4183_v35 = vld [vmem:[%s5474_s21 + $0x210] sm:$0xf] }
  0x9e   : > { %v4184_v45 = vor.u32 %v4914_v38, %v4183_v35  ;;  %v4151_v35 = vld [vmem:[%s5474_s21 + $0x1d0] sm:$0xf]  ;;  %v5006_v38 = vld [vmem:[%s5474_s21 + $0x4f4] sm:$0xf0] }
  0xad   : > { %1407 = vxpose.xlu0.c.b16.cont [3/6] (short) (narrow) %v4843_v50, 64  ;;  %v4932_v50 = vld [vmem:[%s5474_s21 + $0x2a4] sm:$0xf0] }
  0xb9   : > { %v5735_v52 = vpop.trf.xlu0 }
  0xba   : > { %2462 = vmatmul.bf16.vlgmr.msra.gmra.mxu0 %v5735_v52 }
  0xbb   : > { %2566 = vmatpush.bf16.msra.mxu0 %v4232_v60  ;;  %v4104_v60 = vor.u32 %v4894_v57, %v4103_v56 }
  0xbd   : > { %1408 = vxpose.xlu0.c.b16.cont [4/6] (short) (narrow) %v4844_v62, 64  ;;  %v4990_v62 = vld [vmem:[%s5474_s21 + $0x474] sm:$0xf0] }
  0xbf   : > { %5104 = vmatpush.lsf.bf16.msrb.mxu0 %v4771_v34  ;;  %v4256_v34 = vor.u32 %v4932_v50, %v4255_v49 }
  0xc1   : > { %v5763_v17 = vpop.trf.xlu0 }
  0xc2   : > { %2490 = vmatmul.bf16.vlgmr.msra.gmra.mxu1 %v5763_v17 }
  0xc3   : > { %2567 = vmatpush.bf16.msra.mxu0 %v4224_v2  ;;  %2594 = vmatpush.bf16.msra.mxu1 %v4296_v11  ;;  %v4928_v2 = vld [vmem:[%s5474_s21 + $0x284] sm:$0xf0]  ;;  %v4800_v11 = vld [vmem:[%s6778_s0 + $0x1b8] sm:$0xff] }
  0xc4   : > { %v4240_v7 = vor.u32 %v4928_v2, %v4239_v1  ;;  %v4135_v1 = vld [vmem:[%s5474_s21 + $0x1b0] sm:$0xf]  ;;  %v4902_v2 = vld [vmem:[%s5474_s21 + $0x1b4] sm:$0xf0] }
  0xc5   : > { %v4136_v16 = vor.u32 %v4902_v2, %v4135_v1  ;;  %v4954_v1 = vld [vmem:[%s5474_s21 + $0x354] sm:$0xf0] }
  0xc7   : > { %5105 = vmatpush.lsf.bf16.msrb.mxu0 %v4770_v0  ;;  %5165 = vmatpush.lsf.bf16.msrb.mxu1 %v5592_v12  ;;  %v4892_v0 = vld [vmem:[%s5474_s21 + $0x164] sm:$0xf0] }
  0xc8   : > { %v4096_v5 = vor.u32 %v4892_v0, %v4095_v63  ;;  %v4535_v63 = vld [vmem:[%s5474_s21 + $0x4d0] sm:$0xf] }
  0xc9   : > { %v5782_v12 = vpop.trf.xlu0 }
  0xca   : > { %2467 = vmatmul.bf16.gmra.mxu0 %v5782_v12 }
  0xcb   : > { %2568 = vmatpush.bf16.msra.mxu0 %v4216_v10  ;;  %2595 = vmatpush.bf16.msra.mxu1 %v4288_v18  ;;  %v4488_v10 = vor.u32 %v4990_v62, %v4487_v4  ;;  %v4988_v18 = vld [vmem:[%s5474_s21 + $0x464] sm:$0xf0]  ;;  %v5002_v62 = vld [vmem:[%s5474_s21 + $0x4d4] sm:$0xf0] }
  0xcd   : > { %1409 = vxpose.xlu0.c.b16.cont [5/6] (short) (narrow) %v4845_v44, 64  ;;  %v4463_v44 = vld [vmem:[%s5474_s21 + $0x440] sm:$0xf] }
  0xcf   : > { %5106 = vmatpush.lsf.bf16.msrb.mxu0 %v4769_v9  ;;  %5166 = vmatpush.lsf.bf16.msrb.mxu1 %v5615_v22  ;;  %v4799_v22 = vld [vmem:[%s6778_s0 + $0x1b0] sm:$0xff]  ;;  %v4910_v9 = vld [vmem:[%s5474_s21 + $0x1f4] sm:$0xf0] }
  0xd0   : > { %5335 = vxpose.binary.xlu1.c.b16.cont [7/16] (narrow) %v4807_v42, %v4799_v22, 64  ;;  %v4168_v19 = vor.u32 %v4910_v9, %v4167_v8  ;;  %v4886_v22 = vld [vmem:[%s5474_s21 + $0x134] sm:$0xf0]  ;;  %v4552_v42 = vor.u32 %v5006_v38, %v4551_v32  ;;  %v4536_v9 = vor.u32 %v5002_v62, %v4535_v63  ;;  %v4431_v38 = vld [vmem:[%s5474_s21 + $0x400] sm:$0xf] }
  0xd1   : > { %v5802_v51 = vpop.trf.xlu0  ;;  %v4072_v50 = vor.u32 %v4886_v22, %v4071_v40  ;;  %v4882_v8 = vld [vmem:[%s5474_s21 + $0x114] sm:$0xf0]  ;;  %v4976_v22 = vld [vmem:[%s5474_s21 + $0x404] sm:$0xf0] }
  0xd2   : > { %2495 = vmatmul.bf16.gmra.mxu1 %v5802_v51  ;;  %v4998_v32 = vld [vmem:[%s5474_s21 + $0x4b4] sm:$0xf0]  ;;  %v4992_v62 = vld [vmem:[%s5474_s21 + $0x484] sm:$0xf0] }
  0xd3   : > { %2569 = vmatpush.bf16.msra.mxu0 %v4208_v6  ;;  %2596 = vmatpush.bf16.msra.mxu1 %v4280_v27  ;;  %v4479_v6 = vld [vmem:[%s5474_s21 + $0x460] sm:$0xf]  ;;  %v4958_v40 = vld [vmem:[%s5474_s21 + $0x374] sm:$0xf0] }
  0xd4   : > { %v4480_v21 = vor.u32 %v4988_v18, %v4479_v6  ;;  %v4127_v18 = vld [vmem:[%s5474_s21 + $0x1a0] sm:$0xf] }
  0xd7   : > { %2570 = vmatpush.bf16.msra.mxu0 %v4200_v26  ;;  %2597 = vmatpush.bf16.msra.mxu1 %v4272_v37  ;;  %v4908_v26 = vld [vmem:[%s5474_s21 + $0x1e4] sm:$0xf0]  ;;  %v4472_v37 = vor.u32 %v4986_v31, %v4471_v30 }
  0xd8   : > { %v4160_v33 = vor.u32 %v4908_v26, %v4159_v25  ;;  %v4047_v25 = vld [vmem:[%s5474_s21 + $0x100] sm:$0xf]  ;;  %v4880_v26 = vld [vmem:[%s5474_s21 + $0x104] sm:$0xf0] }
  0xd9   : > { %v5813_v3 = vpop.trf.xlu0 }
  0xda   : > { %2472 = vmatmul.bf16.vlgmr.msra.gmra.mxu2 %v5813_v3 }
  0xdb   : > { %2571 = vmatpush.bf16.msra.mxu0 %v4192_v36  ;;  %2598 = vmatpush.bf16.msra.mxu1 %v4264_v46  ;;  %v4906_v36 = vld [vmem:[%s5474_s21 + $0x1d4] sm:$0xf0]  ;;  %v4543_v46 = vld [vmem:[%s5474_s21 + $0x4e0] sm:$0xf] }
  0xdc   : > { %2510 = vmatpush.bf16.msra.mxu2 %v4104_v60  ;;  %v4152_v49 = vor.u32 %v4906_v36, %v4151_v35  ;;  %v4544_v56 = vor.u32 %v5004_v20, %v4543_v46  ;;  %v4455_v60 = vld [vmem:[%s5474_s21 + $0x430] sm:$0xf]  ;;  %v4898_v36 = vld [vmem:[%s5474_s21 + $0x194] sm:$0xf0]  ;;  %v4111_v20 = vld [vmem:[%s5474_s21 + $0x180] sm:$0xf] }
  0xdd   : > { %1410 = vxpose.xlu0.c.b16.end [6/6] (short) (narrow) %v4846_v14, 64  ;;  %v5000_v14 = vld [vmem:[%s5474_s21 + $0x4c4] sm:$0xf0]  ;;  %v4119_v35 = vld [vmem:[%s5474_s21 + $0x190] sm:$0xf] }
  0xde   : > { %v4120_v46 = vor.u32 %v4898_v36, %v4119_v35  ;;  %v4311_v35 = vld [vmem:[%s5474_s21 + $0x310] sm:$0xf]  ;;  %v4946_v36 = vld [vmem:[%s5474_s21 + $0x314] sm:$0xf0] }
  0xdf   : > { %2572 = vmatpush.bf16.msra.mxu0 %v4184_v45  ;;  %2599 = vmatpush.bf16.msra.mxu1 %v4256_v34  ;;  %v4984_v45 = vld [vmem:[%s5474_s21 + $0x444] sm:$0xf0] }
  0xe0   : > { %5336 = vxpose.binary.xlu1.c.b16.end [8/16] (narrow) %v4808_v13, %v4800_v11, 64  ;;  %v4464_v48 = vor.u32 %v4984_v45, %v4463_v44  ;;  %v4904_v34 = vld [vmem:[%s5474_s21 + $0x1c4] sm:$0xf0]  ;;  %v4527_v13 = vld [vmem:[%s5474_s21 + $0x4c0] sm:$0xf] }
  0xe1   : > { %2511 = vmatpush.bf16.msra.mxu2 %v4096_v5  ;;  %v5835_v27 = vpop.trf.xlu0  ;;  %v4064_v5 = vor.u32 %v4884_v59, %v4063_v58  ;;  %v4980_v11 = vld [vmem:[%s5474_s21 + $0x424] sm:$0xf0]  ;;  %v4511_v44 = vld [vmem:[%s5474_s21 + $0x4a0] sm:$0xf]  ;;  %v4994_v58 = vld [vmem:[%s5474_s21 + $0x494] sm:$0xf0] }
  0xe2   : > { %2500 = vmatmul.bf16.vlgmr.msra.gmra.mxu3 %v5835_v27  ;;  %v4996_v45 = vld [vmem:[%s5474_s21 + $0x4a4] sm:$0xf0] }
  0xe3   : > { %2573 = vmatpush.bf16.msra.mxu0 %v4176_v54  ;;  %2600 = vmatpush.bf16.msra.mxu1 %v4248_v61  ;;  %v4143_v54 = vld [vmem:[%s5474_s21 + $0x1c0] sm:$0xf]  ;;  %v4982_v61 = vld [vmem:[%s5474_s21 + $0x434] sm:$0xf0] }
  0xe4   : > { %2538 = vmatpush.bf16.msra.mxu3 %v4168_v19  ;;  %v4144_v0 = vor.u32 %v4904_v34, %v4143_v54  ;;  %v4456_v4 = vor.u32 %v4982_v61, %v4455_v60  ;;  %v4900_v19 = vld [vmem:[%s5474_s21 + $0x1a4] sm:$0xf0]  ;;  %v4512_v34 = vor.u32 %v4996_v45, %v4511_v44  ;;  %v4423_v60 = vld [vmem:[%s5474_s21 + $0x3f0] sm:$0xf]  ;;  %v4974_v61 = vld [vmem:[%s5474_s21 + $0x3f4] sm:$0xf0] }
  0xe5   : > { %2512 = vmatpush.bf16.msra.mxu2 %v4088_v23  ;;  %v4128_v30 = vor.u32 %v4900_v19, %v4127_v18  ;;  %v4956_v54 = vld [vmem:[%s5474_s21 + $0x364] sm:$0xf0]  ;;  %v4950_v18 = vld [vmem:[%s5474_s21 + $0x334] sm:$0xf0]  ;;  %v4303_v45 = vld [vmem:[%s5474_s21 + $0x300] sm:$0xf] }
  0xe6   : > { %5091 = vmatmul.lmr.bf16.vlgmr.msra.gmra.8.mxu0  ;;  %v4962_v44 = vld [vmem:[%s5474_s21 + $0x394] sm:$0xf0] }
  0xe7   : > { %2678 = vmatpush.bf16.msra.mxu0 %v4488_v10  ;;  %2601 = vmatpush.bf16.msra.mxu1 %v4240_v7  ;;  %v4055_v7 = vld [vmem:[%s5474_s21 + $0x110] sm:$0xf]  ;;  %v4447_v10 = vld [vmem:[%s5474_s21 + $0x420] sm:$0xf] }
  0xe8   : > { %2539 = vmatpush.bf16.msra.mxu3 %v4160_v33  ;;  %v4448_v15 = vor.u32 %v4980_v11, %v4447_v10  ;;  %v4056_v6 = vor.u32 %v4882_v8, %v4055_v7  ;;  %v4048_v33 = vor.u32 %v4880_v26, %v4047_v25  ;;  %v4415_v7 = vld [vmem:[%s5474_s21 + $0x3e0] sm:$0xf]  ;;  %v4972_v8 = vld [vmem:[%s5474_s21 + $0x3e4] sm:$0xf0] }
  0xe9   : > { %2513 = vmatpush.bf16.msra.mxu2 %v4080_v39  ;;  %v5854_v57 = vpop.trf.xlu0  ;;  %v4359_v39 = vld [vmem:[%s5474_s21 + $0x370] sm:$0xf]  ;;  %v4335_v10 = vld [vmem:[%s5474_s21 + $0x340] sm:$0xf]  ;;  %v4952_v11 = vld [vmem:[%s5474_s21 + $0x344] sm:$0xf0] }
  0xea   : > { %5151 = vmatmul.lmr.bf16.vlgmr.msra.gmra.8.mxu1  ;;  %2477 = vmatmul.bf16.gmra.mxu2 %v5854_v57  ;;  %v4968_v25 = vld [vmem:[%s5474_s21 + $0x3c4] sm:$0xf0] }
  0xeb   : > { %2679 = vmatpush.bf16.msra.mxu0 %v4480_v21  ;;  %2706 = vmatpush.bf16.msra.mxu1 %v4552_v42  ;;  %v4528_v21 = vor.u32 %v5000_v14, %v4527_v13  ;;  %v4432_v42 = vor.u32 %v4976_v22, %v4431_v38  ;;  %v4407_v14 = vld [vmem:[%s5474_s21 + $0x3d0] sm:$0xf]  ;;  %v4383_v38 = vld [vmem:[%s5474_s21 + $0x3a0] sm:$0xf] }
  0xec   : > { %2540 = vmatpush.bf16.msra.mxu3 %v4152_v49  ;;  %v4360_v49 = vor.u32 %v4958_v40, %v4359_v39  ;;  %v4964_v39 = vld [vmem:[%s5474_s21 + $0x3a4] sm:$0xf0]  ;;  %v4312_v40 = vor.u32 %v4946_v36, %v4311_v35 }
  0xed   : > { %2514 = vmatpush.bf16.msra.mxu2 %v4072_v50  ;;  %v4351_v50 = vld [vmem:[%s5474_s21 + $0x360] sm:$0xf]  ;;  %v4384_v22 = vor.u32 %v4964_v39, %v4383_v38  ;;  %v4695_v38 = vld [vmem:[%s5474_s21 + $0x610] sm:$0xf]  ;;  %v5042_v39 = vld [vmem:[%s5474_s21 + $0x614] sm:$0xf0] }
  0xee   : > { %5092 = vmatmul.lmr.bf16.gmra.8.mxu0  ;;  %v4352_v63 = vor.u32 %v4956_v54, %v4351_v50  ;;  %v4960_v50 = vld [vmem:[%s5474_s21 + $0x384] sm:$0xf0]  ;;  %v5937_v54 = vld [vmem:[%s6778_s0 + $0x2b8] sm:$0xff] }
  0xef   : > { %2680 = vmatpush.bf16.msra.mxu0 %v4472_v37  ;;  %2707 = vmatpush.bf16.msra.mxu1 %v4544_v56  ;;  %v4520_v37 = vor.u32 %v4998_v32, %v4519_v29  ;;  %v4503_v56 = vld [vmem:[%s5474_s21 + $0x490] sm:$0xf]  ;;  %v5916_v29 = vpop.trf.xlu2  ;;  %v4966_v32 = vld [vmem:[%s5474_s21 + $0x3b4] sm:$0xf0] }
  0xf0   : > { %1245 = vxpose.xlu1.c.b16.start [1/8] (narrow) %v5718_v55, 64  ;;  %2541 = vmatpush.bf16.msra.mxu3 %v4144_v0  ;;  %v4439_v55 = vld [vmem:[%s5474_s21 + $0x410] sm:$0xf]  ;;  %v4504_v2 = vor.u32 %v4994_v58, %v4503_v56 }
  0xf1   : > { %2515 = vmatpush.bf16.msra.mxu2 %v4064_v5  ;;  %v5874_v23 = vpop.trf.xlu0  ;;  %v4440_v31 = vor.u32 %v4978_v28, %v4439_v55  ;;  %v4343_v0 = vld [vmem:[%s5474_s21 + $0x350] sm:$0xf]  ;;  %v4424_v5 = vor.u32 %v4974_v61, %v4423_v60  ;;  %v4319_v55 = vld [vmem:[%s5474_s21 + $0x320] sm:$0xf]  ;;  %v4948_v28 = vld [vmem:[%s5474_s21 + $0x324] sm:$0xf0] }
  0xf2   : > { %5152 = vmatmul.lmr.bf16.gmra.8.mxu1  ;;  %2505 = vmatmul.bf16.gmra.mxu3 %v5874_v23  ;;  %v5946_v58 = vld [vmem:[%s6778_s0 + $0x2b0] sm:$0xff]  ;;  %v5050_v60 = vld [vmem:[%s5474_s21 + $0x654] sm:$0xf0] }
  0xf3   : > { %2681 = vmatpush.bf16.msra.mxu0 %v4464_v48  ;;  %2708 = vmatpush.bf16.msra.mxu1 %v4536_v9  ;;  %v4896_v48 = vld [vmem:[%s5474_s21 + $0x184] sm:$0xf0]  ;;  %v4344_v9 = vor.u32 %v4954_v1, %v4343_v0  ;;  %v4861_v61 = vld [vmem:[%s5474_s21 + $0x74] sm:$0xf]  ;;  %v3977_v1 = vld [vmem:[%s5474_s21 + $0x78] sm:$0xf0] }
  0xf4   : > { %2542 = vmatpush.bf16.msra.mxu3 %v4136_v16  ;;  %v4112_v59 = vor.u32 %v4896_v48, %v4111_v20  ;;  %v4336_v16 = vor.u32 %v4952_v11, %v4335_v10  ;;  %v3969_v10 = vld [vmem:[%s5474_s21 + $0x68] sm:$0xf0] }
  0xf5   : > { %2516 = vmatpush.bf16.msra.mxu2 %v4056_v6  ;;  %v4327_v6 = vld [vmem:[%s5474_s21 + $0x330] sm:$0xf] }
  0xf6   : > { %5093 = vmatmul.lmr.bf16.gmra.8.mxu0  ;;  %v4328_v26 = vor.u32 %v4950_v18, %v4327_v6  ;;  %v5987_v6 = vld [vmem:[%s6778_s0 + $0x298] sm:$0xff] }
  0xf7   : > { %2682 = vmatpush.bf16.msra.mxu0 %v4456_v4  ;;  %2709 = vmatpush.bf16.msra.mxu1 %v4528_v21  ;;  %v4495_v4 = vld [vmem:[%s5474_s21 + $0x480] sm:$0xf] }
  0xf8   : > { %2543 = vmatpush.bf16.msra.mxu3 %v4128_v30  ;;  %v4496_v13 = vor.u32 %v4992_v62, %v4495_v4  ;;  %v4399_v21 = vld [vmem:[%s5474_s21 + $0x3c0] sm:$0xf]  ;;  %v5048_v62 = vld [vmem:[%s5474_s21 + $0x644] sm:$0xf0] }
  0xf9   : > { %2517 = vmatpush.bf16.msra.mxu2 %v4048_v33  ;;  %v4400_v30 = vor.u32 %v4968_v25, %v4399_v21  ;;  %v4320_v33 = vor.u32 %v4948_v28, %v4319_v55  ;;  %v4719_v4 = vld [vmem:[%s5474_s21 + $0x640] sm:$0xf]  ;;  %v3961_v21 = vld [vmem:[%s5474_s21 + $0x58] sm:$0xf0]  ;;  %v5044_v55 = vld [vmem:[%s5474_s21 + $0x624] sm:$0xf0] }
  0xfa   : > { %5153 = vmatmul.lmr.bf16.gmra.8.mxu1  ;;  %v4855_v28 = vld [vmem:[%s5474_s21 + $0x44] sm:$0xf] }
  0xfb   : > { %2683 = vmatpush.bf16.msra.mxu0 %v4448_v15  ;;  %2710 = vmatpush.bf16.msra.mxu1 %v4520_v37  ;;  %v4970_v15 = vld [vmem:[%s5474_s21 + $0x3d4] sm:$0xf0] }
  0xfc   : > { %5197 = vmatmul.lmr.bf16.vlgmr.msra.gmra.8.mxu2  ;;  %2544 = vmatpush.bf16.msra.mxu3 %v4120_v46  ;;  %v4408_v19 = vor.u32 %v4970_v15, %v4407_v14  ;;  %v4944_v46 = vld [vmem:[%s5474_s21 + $0x304] sm:$0xf0]  ;;  %v4711_v14 = vld [vmem:[%s5474_s21 + $0x630] sm:$0xf]  ;;  %v5046_v15 = vld [vmem:[%s5474_s21 + $0x634] sm:$0xf0] }
  0xfd   : > { %2622 = vmatpush.bf16.msra.mxu2 %v4360_v49  ;;  %v4304_v48 = vor.u32 %v4944_v46, %v4303_v45  ;;  %v4367_v49 = vld [vmem:[%s5474_s21 + $0x380] sm:$0xf]  ;;  %v4712_v18 = vor.u32 %v5046_v15, %v4711_v14  ;;  %v4615_v45 = vld [vmem:[%s5474_s21 + $0x570] sm:$0xf]  ;;  %v5022_v46 = vld [vmem:[%s5474_s21 + $0x574] sm:$0xf0] }
  0xfe   : > { %5094 = vmatmul.lmr.bf16.gmra.8.mxu0 }
  0xff   : > { %2684 = vmatpush.bf16.msra.mxu0 %v4440_v31  ;;  %2711 = vmatpush.bf16.msra.mxu1 %v4512_v34  ;;  %v4391_v31 = vld [vmem:[%s5474_s21 + $0x3b0] sm:$0xf]  ;;  %v4368_v34 = vor.u32 %v4960_v50, %v4367_v49  ;;  %v5040_v49 = vld [vmem:[%s5474_s21 + $0x604] sm:$0xf0]  ;;  %v4851_v50 = vld [vmem:[%s5474_s21 + $0x24] sm:$0xf] }
 0x100   : > { %1246 = vxpose.xlu1.c.b16.cont [2/8] (narrow) %v5709_v53, 64  ;;  %2545 = vmatpush.bf16.msra.mxu3 %v4112_v59  ;;  %v4416_v53 = vor.u32 %v4972_v8, %v4415_v7  ;;  %v4392_v37 = vor.u32 %v4966_v32, %v4391_v31  ;;  %v4727_v59 = vld [vmem:[%s5474_s21 + $0x650] sm:$0xf]  ;;  %v5969_v7 = vld [vmem:[%s6778_s0 + $0x2a0] sm:$0xff]  ;;  %v3953_v32 = vld [vmem:[%s5474_s21 + $0x48] sm:$0xf0] }
 0x101   : > { %2623 = vmatpush.bf16.msra.mxu2 %v4352_v63  ;;  %v4840_v63 = vld [vmem:[%s6778_s0 + $0x2f8] sm:$0xff]  ;;  %v4728_v0 = vor.u32 %v5050_v60, %v4727_v59  ;;  %v4839_v8 = vld [vmem:[%s6778_s0 + $0x2f0] sm:$0xff]  ;;  %v4837_v31 = vld [vmem:[%s6778_s0 + $0x2e0] sm:$0xff]  ;;  %v3956_v35 = vor.u32 %v4855_v28, %v3953_v32 }
 0x102   : > { %5154 = vmatmul.lmr.bf16.gmra.8.mxu1  ;;  %v6034_v59 = vld [vmem:[%s6778_s0 + $0x280] sm:$0xff]  ;;  %v4835_v60 = vld [vmem:[%s6778_s0 + $0x2d0] sm:$0xff] }
 0x103   : > { %2685 = vmatpush.bf16.msra.mxu0 %v4432_v42  ;;  %2712 = vmatpush.bf16.msra.mxu1 %v4504_v2  ;;  %v5925_v42 = vpop.trf.xlu2  ;;  %v3980_v2 = vor.u32 %v4861_v61, %v3977_v1  ;;  %v3937_v61 = vld [vmem:[%s5474_s21 + $0x28] sm:$0xf0]  ;;  %v4607_v1 = vld [vmem:[%s5474_s21 + $0x560] sm:$0xf] }
 0x104   : > { %5260 = vmatmul.lmr.bf16.vlgmr.msra.gmra.8.mxu3  ;;  %5198 = vmatmul.lmr.bf16.gmra.8.mxu2  ;;  %v4671_v32 = vld [vmem:[%s5474_s21 + $0x5e0] sm:$0xf] }
 0x105   : > { %2650 = vmatpush.bf16.msra.mxu3 %v4424_v5  ;;  %2624 = vmatpush.bf16.msra.mxu2 %v4344_v9  ;;  %v4859_v5 = vld [vmem:[%s5474_s21 + $0x64] sm:$0xf]  ;;  %v4720_v9 = vor.u32 %v5048_v62, %v4719_v4  ;;  %v3940_v4 = vor.u32 %v4851_v50, %v3937_v61  ;;  %v4849_v62 = vld [vmem:[%s5474_s21 + $0x14] sm:$0xf] }
 0x106   : > { %5095 = vmatmul.lmr.bf16.gmra.8.mxu0 }
 0x107   : > { %2713 = vmatpush.bf16.msra.mxu1 %v4496_v13 }
 0x109   : > { %2651 = vmatpush.bf16.msra.mxu3 %v4416_v53  ;;  %2625 = vmatpush.bf16.msra.mxu2 %v4336_v16  ;;  %v3972_v53 = vor.u32 %v4859_v5, %v3969_v10  ;;  %v4857_v16 = vld [vmem:[%s5474_s21 + $0x54] sm:$0xf]  ;;  %v3929_v5 = vld [vmem:[%s5474_s21 + $0x18] sm:$0xf0]  ;;  %v4679_v10 = vld [vmem:[%s5474_s21 + $0x5f0] sm:$0xf] }
 0x10a   : > { %5155 = vmatmul.lmr.bf16.gmra.8.mxu1  ;;  %v3964_v25 = vor.u32 %v4857_v16, %v3961_v21  ;;  %v4599_v16 = vld [vmem:[%s5474_s21 + $0x550] sm:$0xf]  ;;  %v4847_v21 = vld [vmem:[%s5474_s21 + $0x4] sm:$0xf] }
 0x10b   : > { %v5940_v56 = vpop.trf.xlu2 }
 0x10c   : > { %5261 = vmatmul.lmr.bf16.gmra.8.mxu3  ;;  %5199 = vmatmul.lmr.bf16.gmra.8.mxu2 }
 0x10d   : > { %2652 = vmatpush.bf16.msra.mxu3 %v4408_v19  ;;  %2626 = vmatpush.bf16.msra.mxu2 %v4328_v26  ;;  %v4838_v19 = vld [vmem:[%s6778_s0 + $0x2e8] sm:$0xff]  ;;  %v4703_v26 = vld [vmem:[%s5474_s21 + $0x620] sm:$0xf] }
 0x10e   : > { %5096 = vmatmul.lmr.bf16.gmra.8.mxu0 }
 0x110   : > { %1247 = vxpose.xlu1.c.b16.cont [3/8] (narrow) %v5699_v24, 64  ;;  %v4375_v24 = vld [vmem:[%s5474_s21 + $0x390] sm:$0xf] }
 0x111   : > { %2653 = vmatpush.bf16.msra.mxu3 %v4400_v30  ;;  %2627 = vmatpush.bf16.msra.mxu2 %v4320_v33  ;;  %v4376_v20 = vor.u32 %v4962_v44, %v4375_v24  ;;  %v6000_v30 = vld [vmem:[%s6778_s0 + $0x290] sm:$0xff]  ;;  %v4704_v33 = vor.u32 %v5044_v55, %v4703_v26  ;;  %v3945_v24 = vld [vmem:[%s5474_s21 + $0x38] sm:$0xf0]  ;;  %v4696_v44 = vor.u32 %v5042_v39, %v4695_v38  ;;  %v4591_v38 = vld [vmem:[%s5474_s21 + $0x540] sm:$0xf] }
 0x112   : > { %5156 = vmatmul.lmr.bf16.gmra.8.mxu1  ;;  %v5016_v39 = vld [vmem:[%s5474_s21 + $0x544] sm:$0xf0] }
 0x113   : > { %v5975_v11 = vpop.trf.xlu2 }
 0x114   : > { %5262 = vmatmul.lmr.bf16.gmra.8.mxu3  ;;  %5200 = vmatmul.lmr.bf16.gmra.8.mxu2 }
 0x115   : > { %2654 = vmatpush.bf16.msra.mxu3 %v4392_v37  ;;  %2628 = vmatpush.bf16.msra.mxu2 %v4312_v40  ;;  %v4853_v40 = vld [vmem:[%s5474_s21 + $0x34] sm:$0xf] }
 0x116   : > { %5097 = vmatmul.lmr.bf16.gmra.8.mxu0 }
 0x119   : > { %2655 = vmatpush.bf16.msra.mxu3 %v4384_v22  ;;  %2629 = vmatpush.bf16.msra.mxu2 %v4304_v48  ;;  %v4836_v22 = vld [vmem:[%s6778_s0 + $0x2d8] sm:$0xff]  ;;  %v4687_v48 = vld [vmem:[%s5474_s21 + $0x600] sm:$0xf] }
 0x11a   : > { %5157 = vmatmul.lmr.bf16.gmra.8.mxu1 }
 0x11b   : > { %v6008_v36 = vpop.trf.xlu2 }
 0x11c   : > { %5263 = vmatmul.lmr.bf16.gmra.8.mxu3  ;;  %5201 = vmatmul.lmr.bf16.gmra.8.mxu2  ;;  %v5977_v13 = vpop.trf.xlu1 }
 0x11d   : > { %2656 = vmatpush.bf16.msra.mxu3 %v4376_v20  ;;  %5205 = vmatpush.lsf.bf16.msrb.mxu2 %v5937_v54  ;;  %v3948_v20 = vor.u32 %v4853_v40, %v3945_v24  ;;  %v4833_v40 = vld [vmem:[%s6778_s0 + $0x2c0] sm:$0xff] }
 0x11e   : > { %5098 = vmatmul.lmr.bf16.gmra.8.mxu0 }
 0x120   : > { %1248 = vxpose.xlu1.c.b16.cont [4/8] (narrow) %v5680_v47, 64  ;;  %v5955_v47 = vld [vmem:[%s6778_s0 + $0x2a8] sm:$0xff] }
 0x121   : > { %2657 = vmatpush.bf16.msra.mxu3 %v4368_v34  ;;  %5206 = vmatpush.lsf.bf16.msrb.mxu2 %v5946_v58 }
 0x122   : > { %5158 = vmatmul.lmr.bf16.gmra.8.mxu1 }
 0x124   : > { %5264 = vmatmul.lmr.bf16.gmra.8.mxu3  ;;  %5202 = vmatmul.lmr.bf16.gmra.8.mxu2  ;;  %v6010_v37 = vpop.trf.xlu1 }
 0x125   : > { %5107 = vllmr.8.mxu0  ;;  %5207 = vmatpush.lsf.bf16.msrb.mxu2 %v5955_v47 }
 0x126   : > { %2686 = vmatmul.bf16.vlgmr.msra.gmra.mxu0 %v5916_v29  ;;  %5268 = vmatpush.lsf.bf16.msrb.mxu3 %v4840_v63 }
 0x127   : > { %2792 = vmatpush.bf16.msra.mxu0 %v4728_v0  ;;  %v4688_v0 = vor.u32 %v5040_v49, %v4687_v48  ;;  %v5014_v48 = vld [vmem:[%s5474_s21 + $0x534] sm:$0xf0] }
 0x129   : > { %5167 = vllmr.8.mxu1  ;;  %5208 = vmatpush.lsf.bf16.msrb.mxu2 %v5969_v7 }
 0x12a   : > { %2714 = vmatmul.bf16.vlgmr.msra.gmra.mxu1 %v5925_v42  ;;  %5269 = vmatpush.lsf.bf16.msrb.mxu3 %v4839_v8 }
 0x12b   : > { %2818 = vmatpush.bf16.msra.mxu1 %v3980_v2  ;;  %5116 = vmatpush.lsf.bf16.msrb.mxu0 %v4840_v63  ;;  %v4616_v63 = vor.u32 %v5022_v46, %v4615_v45  ;;  %v5020_v2 = vld [vmem:[%s5474_s21 + $0x564] sm:$0xf0]  ;;  %v5034_v45 = vld [vmem:[%s5474_s21 + $0x5d4] sm:$0xf0]  ;;  %v4592_v46 = vor.u32 %v5016_v39, %v4591_v38 }
 0x12c   : > { %5265 = vmatmul.lmr.bf16.gmra.8.mxu3  ;;  %5203 = vmatmul.lmr.bf16.gmra.8.mxu2  ;;  %v4608_v14 = vor.u32 %v5020_v2, %v4607_v1  ;;  %v6054_v15 = vpop.trf.xlu1  ;;  %v4655_v1 = vld [vmem:[%s5474_s21 + $0x5c0] sm:$0xf]  ;;  %v5032_v2 = vld [vmem:[%s5474_s21 + $0x5c4] sm:$0xf0] }
 0x12d   : > { %5209 = vmatpush.lsf.bf16.msrb.mxu2 %v5987_v6 }
 0x12e   : > { %5270 = vmatpush.lsf.bf16.msrb.mxu3 %v4838_v19 }
 0x12f   : > { %2793 = vmatpush.bf16.msra.mxu0 %v4720_v9  ;;  %2819 = vmatpush.bf16.msra.mxu1 %v3972_v53  ;;  %v6050_v9 = vpop.trf.xlu2  ;;  %v5038_v53 = vld [vmem:[%s5474_s21 + $0x5f4] sm:$0xf0] }
 0x130   : > { %1249 = vxpose.xlu1.c.b16.cont [5/8] (narrow) %v5664_v43, 64  ;;  %v6018_v43 = vld [vmem:[%s6778_s0 + $0x288] sm:$0xff]  ;;  %v4680_v28 = vor.u32 %v5038_v53, %v4679_v10  ;;  %v4656_v10 = vor.u32 %v5032_v2, %v4655_v1  ;;  %v4647_v53 = vld [vmem:[%s5474_s21 + $0x5b0] sm:$0xf]  ;;  %v4169_v1 = vld [vmem:[%s5474_s21 + $0x1f8] sm:$0xf0] }
 0x131   : > { %5210 = vmatpush.lsf.bf16.msrb.mxu2 %v6000_v30  ;;  %v5372_v2 = vld [vmem:[%s6778_s0 + $0x148] sm:$0xff] }
 0x132   : > { %5271 = vmatpush.lsf.bf16.msrb.mxu3 %v4837_v31 }
 0x133   : > { %5117 = vmatpush.lsf.bf16.msrb.mxu0 %v4839_v8  ;;  %2820 = vmatpush.bf16.msra.mxu1 %v3964_v25  ;;  %v4834_v8 = vld [vmem:[%s6778_s0 + $0x2c8] sm:$0xff] }
 0x134   : > { %5266 = vmatmul.lmr.bf16.gmra.8.mxu3  ;;  %5204 = vmatmul.lmr.bf16.gmra.8.mxu2  ;;  %v3921_v25 = vld [vmem:[%s5474_s21 + $0x8] sm:$0xf0]  ;;  %v6081_v50 = vpop.trf.xlu1 }
 0x135   : > { %5211 = vmatpush.lsf.bf16.msrb.mxu2 %v6018_v43 }
 0x136   : > { %2691 = vmatmul.bf16.gmra.mxu0 %v5940_v56  ;;  %5272 = vmatpush.lsf.bf16.msrb.mxu3 %v4836_v22 }
 0x137   : > { %2794 = vmatpush.bf16.msra.mxu0 %v4712_v18  ;;  %2821 = vmatpush.bf16.msra.mxu1 %v3956_v35  ;;  %v2463_v34 = vpop.f32.mrf.mxu0  ;;  %v5018_v18 = vld [vmem:[%s5474_s21 + $0x554] sm:$0xf0]  ;;  %v6079_v49 = vpop.trf.xlu2 }
 0x138   : > { %v4600_v35 = vor.u32 %v5018_v18, %v4599_v16  ;;  %v5368_v18 = vld [vmem:[%s6778_s0 + $0x160] sm:$0xff] }
 0x139   : > { %5212 = vmatpush.lsf.bf16.msrb.mxu2 %v6034_v59 }
 0x13a   : > { %2719 = vmatmul.bf16.gmra.mxu1 %v5975_v11  ;;  %5273 = vmatpush.lsf.bf16.msrb.mxu3 %v4835_v60 }
 0x13b   : > { %5118 = vmatpush.lsf.bf16.msrb.mxu0 %v4838_v19  ;;  %2822 = vmatpush.bf16.msra.mxu1 %v3948_v20  ;;  %v3932_v19 = vor.u32 %v4849_v62, %v3929_v5  ;;  %v4583_v20 = vld [vmem:[%s5474_s21 + $0x530] sm:$0xf]  ;;  %v4575_v62 = vld [vmem:[%s5474_s21 + $0x520] sm:$0xf]  ;;  %v5012_v5 = vld [vmem:[%s5474_s21 + $0x524] sm:$0xf0] }
 0x13c   : > { %5267 = vmatmul.lmr.bf16.gmra.8.mxu3  ;;  %2630 = vmatmul.bf16.vlgmr.msra.gmra.mxu2 %v5977_v13  ;;  %v4576_v16 = vor.u32 %v5012_v5, %v4575_v62  ;;  %v5024_v62 = vld [vmem:[%s5474_s21 + $0x584] sm:$0xf0] }
 0x13d   : > { %2734 = vmatpush.bf16.msra.mxu2 %v4616_v63 }
 0x13e   : > { %5274 = vmatpush.lsf.bf16.msrb.mxu3 %v4834_v8 }
 0x13f   : > { %2795 = vmatpush.bf16.msra.mxu0 %v4704_v33  ;;  %2823 = vmatpush.bf16.msra.mxu1 %v3940_v4  ;;  %v2465_v26 = vpop.f32.mrf.mxu0  ;;  %v2491_v55 = vpop.f32.mrf.mxu1  ;;  %v5036_v33 = vld [vmem:[%s5474_s21 + $0x5e4] sm:$0xf0]  ;;  %v4584_v4 = vor.u32 %v5014_v48, %v4583_v20 }
 0x140   : > { %1250 = vxpose.xlu1.c.b16.cont [6/8] (narrow) %v5655_v41, 64  ;;  %v5365_v41 = vld [vmem:[%s6778_s0 + $0x178] sm:$0xff]  ;;  %v4672_v24 = vor.u32 %v5036_v33, %v4671_v32  ;;  %v5028_v32 = vld [vmem:[%s5474_s21 + $0x5a4] sm:$0xf0]  ;;  %v4567_v33 = vld [vmem:[%s5474_s21 + $0x510] sm:$0xf]  ;;  %v6115_v38 = vpop.trf.xlu2 }
 0x141   : > { %2735 = vmatpush.bf16.msra.mxu2 %v4608_v14  ;;  %v5030_v14 = vld [vmem:[%s5474_s21 + $0x5b4] sm:$0xf0] }
 0x143   : > { %5119 = vmatpush.lsf.bf16.msrb.mxu0 %v4837_v31  ;;  %v6061_v31 = vadd.f32 %v2491_v55, %v2463_v34  ;;  %2824 = vmatpush.bf16.msra.mxu1 %v3932_v19  ;;  %v5366_v34 = vld [vmem:[%s6778_s0 + $0x170] sm:$0xff] }
 0x144   : > { %2658 = vmatmul.bf16.vlgmr.msra.gmra.mxu3 %v6010_v37  ;;  %v5369_v55 = vld [vmem:[%s6778_s0 + $0xb0] sm:$0xff] }
 0x145   : > { %2762 = vmatpush.bf16.msra.mxu3 %v4680_v28 }
 0x146   : > { %2696 = vmatmul.bf16.gmra.mxu0 %v6008_v36 }
 0x147   : > { %2796 = vmatpush.bf16.msra.mxu0 %v4696_v44  ;;  %v4663_v44 = vld [vmem:[%s5474_s21 + $0x5d0] sm:$0xf]  ;;  %v2493_v61 = vpop.f32.mrf.mxu1 }
 0x148   : > { %v4664_v63 = vor.u32 %v5034_v45, %v4663_v44  ;;  %v4559_v44 = vld [vmem:[%s5474_s21 + $0x500] sm:$0xf]  ;;  %v5008_v45 = vld [vmem:[%s5474_s21 + $0x504] sm:$0xf0] }
 0x149   : > { %5275 = vmatpush.lsf.bf16.msrb.mxu3 %v4833_v40 }
 0x14a   : > { %2724 = vmatmul.bf16.gmra.mxu1 %v6050_v9 }
 0x14b   : > { %2797 = vmatpush.bf16.msra.mxu0 %v4688_v0  ;;  %5213 = vllmr.8.mxu2  ;;  %v6086_v0 = vadd.f32 %v2493_v61, %v2465_v26  ;;  %v4639_v26 = vld [vmem:[%s5474_s21 + $0x5a0] sm:$0xf] }
 0x14c   : > { %2635 = vmatmul.bf16.gmra.mxu2 %v6054_v15 }
 0x14d   : > { %5222 = vmatpush.lsf.bf16.msrb.mxu2 %v5365_v41  ;;  %2763 = vmatpush.bf16.msra.mxu3 %v4672_v24  ;;  %v4631_v41 = vld [vmem:[%s5474_s21 + $0x590] sm:$0xf]  ;;  %v5026_v24 = vld [vmem:[%s5474_s21 + $0x594] sm:$0xf0] }
 0x14f   : > { %5120 = vmatpush.lsf.bf16.msrb.mxu0 %v4836_v22  ;;  %v3924_v22 = vor.u32 %v4847_v21, %v3921_v25  ;;  %v2496_v21 = vpop.f32.mrf.mxu1  ;;  %v4648_v25 = vor.u32 %v5030_v14, %v4647_v53  ;;  %v4161_v53 = vld [vmem:[%s5474_s21 + $0x1e8] sm:$0xf0]  ;;  %v5373_v14 = vld [vmem:[%s6778_s0 + $0x140] sm:$0xff] }
 0x150   : > { %1251 = vxpose.xlu1.c.b16.cont [7/8] (narrow) %v5369_v55, 64 }
 0x151   : > { %2736 = vmatpush.bf16.msra.mxu2 %v4600_v35  ;;  %2825 = vmatpush.bf16.msra.mxu1 %v3924_v22  ;;  %v5010_v35 = vld [vmem:[%s5474_s21 + $0x514] sm:$0xf0]  ;;  %v4640_v22 = vor.u32 %v5028_v32, %v4639_v26  ;;  %v4925_v26 = vld [vmem:[%s5474_s21 + $0x274] sm:$0xf]  ;;  %v4233_v32 = vld [vmem:[%s5474_s21 + $0x278] sm:$0xf0] }
 0x152   : > { %2764 = vmatpush.bf16.msra.mxu3 %v4664_v63  ;;  %v4568_v39 = vor.u32 %v5010_v35, %v4567_v33  ;;  %v4909_v63 = vld [vmem:[%s5474_s21 + $0x1f4] sm:$0xf]  ;;  %v4236_v35 = vor.u32 %v4925_v26, %v4233_v32 }
 0x153   : > { %5121 = vmatpush.lsf.bf16.msrb.mxu0 %v4835_v60  ;;  %v2468_v60 = vpop.f32.mrf.mxu0  ;;  %5276 = vllmr.8.mxu3  ;;  %v4897_v26 = vld [vmem:[%s5474_s21 + $0x194] sm:$0xf] }
 0x154   : > { %v6107_v28 = vadd.f32 %v2496_v21, %v2468_v60  ;;  %2663 = vmatmul.bf16.gmra.mxu3 %v6081_v50  ;;  %v4917_v32 = vld [vmem:[%s5474_s21 + $0x234] sm:$0xf] }
 0x155   : > { %5223 = vmatpush.lsf.bf16.msrb.mxu2 %v5366_v34  ;;  %v4632_v34 = vor.u32 %v5026_v24, %v4631_v41  ;;  %v4145_v41 = vld [vmem:[%s5474_s21 + $0x1c8] sm:$0xf0]  ;;  %v4923_v24 = vld [vmem:[%s5474_s21 + $0x264] sm:$0xf] }
 0x156   : > { %2701 = vmatmul.bf16.gmra.mxu0 %v6079_v49  ;;  %5285 = vmatpush.lsf.bf16.msrb.mxu3 %v5937_v54  ;;  %v6109_v54 = vpop.trf.xlu1 }
 0x157   : > { %5122 = vmatpush.lsf.bf16.msrb.mxu0 %v4834_v8  ;;  %v5367_v8 = vld [vmem:[%s6778_s0 + $0x168] sm:$0xff]  ;;  %v2498_v20 = vpop.f32.mrf.mxu1 }
 0x159   : > { %2737 = vmatpush.bf16.msra.mxu2 %v4592_v46  ;;  %v5371_v46 = vld [vmem:[%s6778_s0 + $0x150] sm:$0xff] }
 0x15a   : > { %2765 = vmatpush.bf16.msra.mxu3 %v4656_v10  ;;  %2729 = vmatmul.bf16.gmra.mxu1 %v6115_v38  ;;  %v4907_v10 = vld [vmem:[%s5474_s21 + $0x1e4] sm:$0xf] }
 0x15b   : > { %5123 = vmatpush.lsf.bf16.msrb.mxu0 %v4833_v40  ;;  %v2470_v19 = vpop.f32.mrf.mxu0  ;;  %v5370_v40 = vld [vmem:[%s6778_s0 + $0x158] sm:$0xff] }
 0x15c   : > { %v6134_v60 = vadd.f32 %v2498_v20, %v2470_v19  ;;  %2640 = vmatmul.bf16.gmra.mxu2 %v6109_v54  ;;  %v5374_v19 = vld [vmem:[%s6778_s0 + $0xb8] sm:$0xff] }
 0x15d   : > { %5224 = vmatpush.lsf.bf16.msrb.mxu2 %v5367_v8  ;;  %v2473_v8 = vpop.f32.mrf.mxu2 }
 0x15e   : > { %5286 = vmatpush.lsf.bf16.msrb.mxu3 %v5946_v58  ;;  %v6125_v58 = vpop.trf.xlu0  ;;  %v6139_v61 = vpop.trf.xlu1 }
 0x160   : > { %1252 = vxpose.xlu1.c.b16.end [8/8] (narrow) %v5374_v19, 64  ;;  %v4209_v19 = vld [vmem:[%s5474_s21 + $0x248] sm:$0xf0] }
 0x161   : > { %2738 = vmatpush.bf16.msra.mxu2 %v4584_v4  ;;  %v4623_v4 = vld [vmem:[%s5474_s21 + $0x580] sm:$0xf] }
 0x162   : > { %2766 = vmatpush.bf16.msra.mxu3 %v4648_v25  ;;  %v4624_v5 = vor.u32 %v5024_v62, %v4623_v4  ;;  %v4153_v25 = vld [vmem:[%s5474_s21 + $0x1d8] sm:$0xf0] }
 0x163   : > { %v6132_v48 = vpop.f32.mrf.mxu0 }
 0x164   : > { %2668 = vmatmul.bf16.gmra.mxu3 %v6139_v61 }
 0x165   : > { %5225 = vmatpush.lsf.bf16.msrb.mxu2 %v5368_v18  ;;  %v4164_v18 = vor.u32 %v4907_v10, %v4161_v53  ;;  %v4919_v10 = vld [vmem:[%s5474_s21 + $0x244] sm:$0xf] }
 0x166   : > { %5287 = vmatpush.lsf.bf16.msrb.mxu3 %v5955_v47  ;;  %v4560_v47 = vor.u32 %v5008_v45, %v4559_v44  ;;  %4733 = vmatmul.msk.bf16.vlgmr.msra.gmra.mxu0 %vm2441_vm0, %v6125_v58  ;;  %v6169_v33 = vpop.trf.xlu1 }
 0x167   : > { %v6160_v21 = vpop.f32.mrf.mxu1 }
 0x169   : > { %2739 = vmatpush.bf16.msra.mxu2 %v4576_v16 }
 0x16a   : > { %2767 = vmatpush.bf16.msra.mxu3 %v4640_v22  ;;  %2826 = vmatmul.bf16.vlgmr.msra.gmra.mxu1 %v5735_v52  ;;  %v4903_v22 = vld [vmem:[%s5474_s21 + $0x1c4] sm:$0xf]  ;;  %v6179_v52 = vpop.trf.xlu0 }
 0x16b   : > { %v6155_v16 = vpop.f32.mrf.mxu0  ;;  %2930 = vmatpush.bf16.msra.mxu1 %v4236_v35  ;;  %v4148_v45 = vor.u32 %v4903_v22, %v4145_v41 }
 0x16c   : > { %2645 = vmatmul.bf16.gmra.mxu2 %v6169_v33 }
 0x16d   : > { %5226 = vmatpush.lsf.bf16.msrb.mxu2 %v5370_v40  ;;  %v2501_v40 = vpop.f32.mrf.mxu3 }
 0x16e   : > { %5288 = vmatpush.lsf.bf16.msrb.mxu3 %v5969_v7  ;;  %v4172_v7 = vor.u32 %v4909_v63, %v4169_v1  ;;  %v4921_v63 = vld [vmem:[%s5474_s21 + $0x254] sm:$0xf] }
 0x16f   : > { %v6182_v20 = vpop.f32.mrf.mxu1 }
 0x170   : > { %2902 = vmatpush.bf16.msra.mxu0 %v4172_v7 }
 0x171   : > { %2740 = vmatpush.bf16.msra.mxu2 %v4568_v39  ;;  %v2475_v39 = vpop.f32.mrf.mxu2 }
 0x172   : > { %2768 = vmatpush.bf16.msra.mxu3 %v4632_v34 }
 0x173   : > { %v6177_v44 = vpop.f32.mrf.mxu0 }
 0x174   : > { %2903 = vmatpush.bf16.msra.mxu0 %v4164_v18 }
 0x175   : > { %5227 = vmatpush.lsf.bf16.msrb.mxu2 %v5371_v46  ;;  %v4225_v46 = vld [vmem:[%s5474_s21 + $0x268] sm:$0xf0]  ;;  %v2503_v7 = vpop.f32.mrf.mxu3 }
 0x176   : > { %5289 = vmatpush.lsf.bf16.msrb.mxu3 %v5987_v6  ;;  %v4905_v6 = vld [vmem:[%s5474_s21 + $0x1d4] sm:$0xf]  ;;  %v4228_v34 = vor.u32 %v4923_v24, %v4225_v46  ;;  %4734 = vmatmul.msk.bf16.gmra.mxu0 %vm2441_vm0, %v6179_v52 }
 0x177   : > { %v4156_v55 = vor.u32 %v4905_v6, %v4153_v25  ;;  %v6202_v6 = vpop.f32.mrf.mxu1  ;;  %v4212_v25 = vor.u32 %v4919_v10, %v4209_v19  ;;  %v4877_v24 = vld [vmem:[%s5474_s21 + $0xf4] sm:$0xf] }
 0x178   : > { %2931 = vmatpush.bf16.msra.mxu1 %v4228_v34  ;;  %v4895_v34 = vld [vmem:[%s5474_s21 + $0x184] sm:$0xf]  ;;  %v4913_v10 = vld [vmem:[%s5474_s21 + $0x214] sm:$0xf] }
 0x179   : > { %2741 = vmatpush.bf16.msra.mxu2 %v4560_v47  ;;  %2904 = vmatpush.bf16.msra.mxu0 %v4156_v55  ;;  %v4137_v47 = vld [vmem:[%s5474_s21 + $0x1b8] sm:$0xf0]  ;;  %v2478_v62 = vpop.f32.mrf.mxu2 }
 0x17a   : > { %2769 = vmatpush.bf16.msra.mxu3 %v4624_v5  ;;  %v4899_v5 = vld [vmem:[%s5474_s21 + $0x1a4] sm:$0xf]  ;;  %v4121_v55 = vld [vmem:[%s5474_s21 + $0x198] sm:$0xf0]  ;;  %2831 = vmatmul.bf16.gmra.mxu1 %v5782_v12 }
 0x17b   : > { %v6197_v53 = vpop.f32.mrf.mxu0  ;;  %v4124_v35 = vor.u32 %v4897_v26, %v4121_v55  ;;  %v4105_v26 = vld [vmem:[%s5474_s21 + $0x178] sm:$0xf0] }
 0x17c   : > { %5214 = vmatmul.lmr.bf16.vlgmr.msra.gmra.8.mxu2 }
 0x17d   : > { %5228 = vmatpush.lsf.bf16.msrb.mxu2 %v5372_v2  ;;  %2905 = vmatpush.bf16.msra.mxu0 %v4148_v45  ;;  %v4217_v2 = vld [vmem:[%s5474_s21 + $0x258] sm:$0xf0]  ;;  %v2506_v41 = vpop.f32.mrf.mxu3 }
 0x17e   : > { %5290 = vmatpush.lsf.bf16.msrb.mxu3 %v6000_v30  ;;  %v6172_v30 = vadd.f32 %v2501_v40, %v2473_v8  ;;  %v4220_v4 = vor.u32 %v4921_v63, %v4217_v2  ;;  %v4129_v8 = vld [vmem:[%s5474_s21 + $0x1a8] sm:$0xf0]  ;;  %v4041_v45 = vld [vmem:[%s5474_s21 + $0xf8] sm:$0xf0]  ;;  %v6212_v46 = vadd.f32 %v2506_v41, %v2478_v62  ;;  %v4875_v62 = vld [vmem:[%s5474_s21 + $0xe4] sm:$0xf] }
 0x17f   : > { %v4132_v18 = vor.u32 %v4899_v5, %v4129_v8  ;;  %v4193_v2 = vld [vmem:[%s5474_s21 + $0x228] sm:$0xf0]  ;;  %v6222_v5 = vpop.f32.mrf.mxu1 }
 0x180   : > { %2932 = vmatpush.bf16.msra.mxu1 %v4220_v4  ;;  %v4044_v4 = vor.u32 %v4877_v24, %v4041_v45  ;;  %v4033_v8 = vld [vmem:[%s5474_s21 + $0xe8] sm:$0xf0] }
 0x181   : > { %5229 = vmatpush.lsf.bf16.msrb.mxu2 %v5373_v14  ;;  %v6199_v14 = vpop.trf.xlu1  ;;  %v2480_v22 = vpop.f32.mrf.mxu2  ;;  %v4036_v55 = vor.u32 %v4875_v62, %v4033_v8  ;;  %v4177_v41 = vld [vmem:[%s5474_s21 + $0x208] sm:$0xf0]  ;;  %v4889_v8 = vld [vmem:[%s5474_s21 + $0x154] sm:$0xf] }
 0x182   : > { %5291 = vmatpush.lsf.bf16.msrb.mxu3 %v6018_v43  ;;  %v4901_v43 = vld [vmem:[%s5474_s21 + $0x1b4] sm:$0xf]  ;;  %v4911_v22 = vld [vmem:[%s5474_s21 + $0x204] sm:$0xf]  ;;  %v4017_v62 = vld [vmem:[%s5474_s21 + $0xc8] sm:$0xf0] }
 0x183   : > { %v4140_v1 = vor.u32 %v4901_v43, %v4137_v47  ;;  %2673 = vmatmul.bf16.gmra.mxu3 %v6199_v14  ;;  %v4113_v43 = vld [vmem:[%s5474_s21 + $0x188] sm:$0xf0]  ;;  %v4915_v47 = vld [vmem:[%s5474_s21 + $0x224] sm:$0xf]  ;;  %v6217_v63 = vpop.f32.mrf.mxu0 }
 0x184   : > { %2933 = vmatpush.bf16.msra.mxu1 %v4212_v25  ;;  %v4116_v12 = vor.u32 %v4895_v34, %v4113_v43  ;;  %v4893_v25 = vld [vmem:[%s5474_s21 + $0x174] sm:$0xf]  ;;  %v4180_v43 = vor.u32 %v4911_v22, %v4177_v41  ;;  %5215 = vmatmul.lmr.bf16.gmra.8.mxu2  ;;  %v4887_v41 = vld [vmem:[%s5474_s21 + $0x144] sm:$0xf] }
 0x185   : > { %2906 = vmatpush.bf16.msra.mxu0 %v4140_v1  ;;  %v6219_v1 = vpop.trf.xlu0  ;;  %2846 = vmatpush.bf16.msra.mxu2 %v4044_v4  ;;  %v4108_v34 = vor.u32 %v4893_v25, %v4105_v26  ;;  %v4869_v25 = vld [vmem:[%s5474_s21 + $0xb4] sm:$0xf]  ;;  %v4009_v26 = vld [vmem:[%s5474_s21 + $0xb8] sm:$0xf0] }
 0x186   : > { %5292 = vmatpush.lsf.bf16.msrb.mxu3 %v6034_v59  ;;  %v6192_v59 = vadd.f32 %v2503_v7, %v2475_v39  ;;  %v4201_v39 = vld [vmem:[%s5474_s21 + $0x238] sm:$0xf0]  ;;  %v4196_v7 = vor.u32 %v4915_v47, %v4193_v2  ;;  %4735 = vmatmul.msk.bf16.gmra.mxu0 %vm2441_vm0, %v6219_v1  ;;  %v4891_v47 = vld [vmem:[%s5474_s21 + $0x164] sm:$0xf] }
 0x187   : > { %v4204_v40 = vor.u32 %v4917_v32, %v4201_v39  ;;  %v2508_v32 = vpop.f32.mrf.mxu3  ;;  %v4025_v39 = vld [vmem:[%s5474_s21 + $0xd8] sm:$0xf0]  ;;  %v6241_v4 = vpop.f32.mrf.mxu1 }
 0x189   : > { %2907 = vmatpush.bf16.msra.mxu0 %v4132_v18  ;;  %2934 = vmatpush.bf16.msra.mxu1 %v4204_v40  ;;  %v4185_v18 = vld [vmem:[%s5474_s21 + $0x218] sm:$0xf0]  ;;  %v2519_v40 = vpop.f32.mrf.mxu2 }
 0x18a   : > { %v4188_v19 = vor.u32 %v4913_v10, %v4185_v18  ;;  %v2520_v24 = vadd.f32 %v2519_v40, %v6061_v31  ;;  %2847 = vmatpush.bf16.msra.mxu2 %v4036_v55  ;;  %2836 = vmatmul.bf16.gmra.mxu1 %v5813_v3  ;;  %v4089_v10 = vld [vmem:[%s5474_s21 + $0x158] sm:$0xf0] }
 0x18b   : > { %v6237_v45 = vpop.f32.mrf.mxu0  ;;  %v4092_v3 = vor.u32 %v4889_v8, %v4089_v10 }
 0x18c   : > { %5216 = vmatmul.lmr.bf16.gmra.8.mxu2 }
 0x18d   : > { %2908 = vmatpush.bf16.msra.mxu0 %v4124_v35  ;;  %2935 = vmatpush.bf16.msra.mxu1 %v4196_v7  ;;  %v4873_v35 = vld [vmem:[%s5474_s21 + $0xd4] sm:$0xf]  ;;  %v4871_v7 = vld [vmem:[%s5474_s21 + $0xc4] sm:$0xf]  ;;  %v6253_v40 = vpop.trf.xlu0 }
 0x18e   : > { %v4028_v2 = vor.u32 %v4873_v35, %v4025_v39  ;;  %v4020_v18 = vor.u32 %v4871_v7, %v4017_v62  ;;  %v4073_v7 = vld [vmem:[%s5474_s21 + $0x138] sm:$0xf0] }
 0x190   : > { %2848 = vmatpush.bf16.msra.mxu2 %v4028_v2  ;;  %v4885_v2 = vld [vmem:[%s5474_s21 + $0x134] sm:$0xf] }
 0x191   : > { %2909 = vmatpush.bf16.msra.mxu0 %v4116_v12  ;;  %2936 = vmatpush.bf16.msra.mxu1 %v4188_v19  ;;  %v4097_v12 = vld [vmem:[%s5474_s21 + $0x168] sm:$0xf0]  ;;  %v2547_v19 = vpop.f32.mrf.mxu3  ;;  %v2521_v55 = vpop.f32.mrf.mxu2 }
 0x192   : > { %v4100_v31 = vor.u32 %v4891_v47, %v4097_v12  ;;  %v2548_v32 = vadd.f32 %v2547_v19, %v2520_v24  ;;  %v2522_v35 = vadd.f32 %v2521_v55, %v6086_v0  ;;  %v6258_v47 = vpop.f32.mrf.mxu1  ;;  %v4867_v12 = vld [vmem:[%s5474_s21 + $0xa4] sm:$0xf]  ;;  %v4001_v24 = vld [vmem:[%s5474_s21 + $0xa8] sm:$0xf0] }
 0x193   : > { %5277 = vmatmul.lmr.bf16.vlgmr.msra.gmra.8.mxu3  ;;  %v6251_v39 = vpop.f32.mrf.mxu0  ;;  %v4004_v62 = vor.u32 %v4867_v12, %v4001_v24  ;;  %v4065_v55 = vld [vmem:[%s5474_s21 + $0x128] sm:$0xf0] }
 0x194   : > { %2874 = vmatpush.bf16.msra.mxu3 %v4108_v34  ;;  %v2576_v22 = vadd.f32 %v6132_v48, %v2548_v32  ;;  %2849 = vmatpush.bf16.msra.mxu2 %v4020_v18  ;;  %v4081_v34 = vld [vmem:[%s5474_s21 + $0x148] sm:$0xf0] }
 0x195   : > { %2937 = vmatpush.bf16.msra.mxu1 %v4180_v43  ;;  %v4012_v43 = vor.u32 %v4869_v25, %v4009_v26  ;;  %v4084_v48 = vor.u32 %v4887_v41, %v4081_v34  ;;  %v4883_v26 = vld [vmem:[%s5474_s21 + $0x124] sm:$0xf]  ;;  %5217 = vmatmul.lmr.bf16.gmra.8.mxu2  ;;  %v4057_v34 = vld [vmem:[%s5474_s21 + $0x118] sm:$0xf0] }
 0x196   : > { %4736 = vmatmul.msk.bf16.gmra.mxu0 %vm2441_vm0, %v6253_v40  ;;  %v6265_v0 = vadd.f32 %v6160_v21, %v2576_v22  ;;  %v4076_v21 = vor.u32 %v4885_v2, %v4073_v7  ;;  %v3993_v22 = vld [vmem:[%s5474_s21 + $0x98] sm:$0xf0]  ;;  %v4068_v41 = vor.u32 %v4883_v26, %v4065_v55  ;;  %v3985_v2 = vld [vmem:[%s5474_s21 + $0x88] sm:$0xf0] }
 0x198   : > { %2875 = vmatpush.bf16.msra.mxu3 %v4100_v31  ;;  %2850 = vmatpush.bf16.msra.mxu2 %v4012_v43 }
 0x199   : > { %v2549_v31 = vpop.f32.mrf.mxu3  ;;  %v2524_v8 = vpop.f32.mrf.mxu2 }
 0x19a   : > { %v2550_v10 = vadd.f32 %v2549_v31, %v2522_v35  ;;  %v2525_v18 = vadd.f32 %v2524_v8, %v6107_v28  ;;  %v6273_v32 = vpop.f32.mrf.mxu1  ;;  %2841 = vmatmul.bf16.gmra.mxu1 %v5854_v57 }
 0x19b   : > { %5278 = vmatmul.lmr.bf16.gmra.8.mxu3  ;;  %v2592_v19 = vpop.f32.mrf.mxu0 }
 0x19c   : > { %2876 = vmatpush.bf16.msra.mxu3 %v4092_v3  ;;  %v2578_v25 = vadd.f32 %v6155_v16, %v2550_v10  ;;  %2851 = vmatpush.bf16.msra.mxu2 %v4004_v62  ;;  %v4865_v3 = vld [vmem:[%s5474_s21 + $0x94] sm:$0xf] }
 0x19d   : > { %v3996_v35 = vor.u32 %v4865_v3, %v3993_v22  ;;  %v4881_v16 = vld [vmem:[%s5474_s21 + $0x114] sm:$0xf]  ;;  %5218 = vmatmul.lmr.bf16.gmra.8.mxu2  ;;  %v4971_v22 = vld [vmem:[%s5474_s21 + $0x3e4] sm:$0xf] }
 0x19e   : > { %v6278_v28 = vadd.f32 %v6182_v20, %v2578_v25  ;;  %v4060_v62 = vor.u32 %v4881_v16, %v4057_v34  ;;  %v4973_v10 = vld [vmem:[%s5474_s21 + $0x3f4] sm:$0xf] }
 0x1a0   : > { %2877 = vmatpush.bf16.msra.mxu3 %v4084_v48  ;;  %2852 = vmatpush.bf16.msra.mxu2 %v3996_v35  ;;  %v4863_v48 = vld [vmem:[%s5474_s21 + $0x84] sm:$0xf]  ;;  %v4417_v35 = vld [vmem:[%s5474_s21 + $0x3e8] sm:$0xf0] }
 0x1a1   : > { %v2552_v43 = vpop.f32.mrf.mxu3  ;;  %v2526_v12 = vpop.f32.mrf.mxu2  ;;  %v3988_v31 = vor.u32 %v4863_v48, %v3985_v2  ;;  %v4420_v16 = vor.u32 %v4971_v22, %v4417_v35  ;;  %v4989_v48 = vld [vmem:[%s5474_s21 + $0x474] sm:$0xf]  ;;  %v4393_v22 = vld [vmem:[%s5474_s21 + $0x3b8] sm:$0xf0] }
 0x1a2   : > { %v2553_v24 = vadd.f32 %v2552_v43, %v2525_v18  ;;  %v2527_v7 = vadd.f32 %v2526_v12, %v6134_v60  ;;  %v2620_v8 = vpop.f32.mrf.mxu1  ;;  %v4425_v18 = vld [vmem:[%s5474_s21 + $0x3f8] sm:$0xf0]  ;;  %v4879_v60 = vld [vmem:[%s5474_s21 + $0x104] sm:$0xf]  ;;  %v4969_v12 = vld [vmem:[%s5474_s21 + $0x3d4] sm:$0xf] }
 0x1a3   : > { %5279 = vmatmul.lmr.bf16.gmra.8.mxu3  ;;  %v6286_v20 = vpop.f32.mrf.mxu0  ;;  %v4428_v25 = vor.u32 %v4973_v10, %v4425_v18  ;;  %v4967_v8 = vld [vmem:[%s5474_s21 + $0x3c4] sm:$0xf]  ;;  %v4401_v10 = vld [vmem:[%s5474_s21 + $0x3c8] sm:$0xf0]  ;;  %v4985_v35 = vld [vmem:[%s5474_s21 + $0x454] sm:$0xf] }
 0x1a4   : > { %2878 = vmatpush.bf16.msra.mxu3 %v4076_v21  ;;  %v2581_v57 = vadd.f32 %v6177_v44, %v2553_v24  ;;  %2853 = vmatpush.bf16.msra.mxu2 %v3988_v31  ;;  %v4049_v21 = vld [vmem:[%s5474_s21 + $0x108] sm:$0xf0]  ;;  %v4409_v24 = vld [vmem:[%s5474_s21 + $0x3d8] sm:$0xf0]  ;;  %v4987_v18 = vld [vmem:[%s5474_s21 + $0x464] sm:$0xf] }
 0x1a5   : > { %v4052_v26 = vor.u32 %v4879_v60, %v4049_v21  ;;  %5219 = vmatmul.lmr.bf16.gmra.8.mxu2  ;;  %v4404_v21 = vor.u32 %v4967_v8, %v4401_v10 }
 0x1a6   : > { %5108 = vmatmul.lmr.bf16.vlgmr.msra.gmra.8.mxu0  ;;  %v6292_v19 = vadd.f32 %v6202_v6, %v2581_v57 }
 0x1a7   : > { %3014 = vmatpush.bf16.msra.mxu0 %v4428_v25  ;;  %v4481_v25 = vld [vmem:[%s5474_s21 + $0x468] sm:$0xf0] }
 0x1a8   : > { %2879 = vmatpush.bf16.msra.mxu3 %v4068_v41 }
 0x1a9   : > { %v2554_v55 = vpop.f32.mrf.mxu3  ;;  %v2529_v44 = vpop.f32.mrf.mxu2 }
 0x1aa   : > { %v2555_v3 = vadd.f32 %v2554_v55, %v2527_v7  ;;  %v2530_v41 = vadd.f32 %v2529_v44, %v6172_v30  ;;  %v6302_v43 = vpop.f32.mrf.mxu1  ;;  %v4412_v30 = vor.u32 %v4969_v12, %v4409_v24  ;;  %v4489_v7 = vld [vmem:[%s5474_s21 + $0x478] sm:$0xf0]  ;;  %5168 = vmatmul.lmr.bf16.vlgmr.msra.gmra.8.mxu1  ;;  %v4484_v55 = vor.u32 %v4987_v18, %v4481_v25  ;;  %v4961_v18 = vld [vmem:[%s5474_s21 + $0x394] sm:$0xf] }
 0x1ab   : > { %5280 = vmatmul.lmr.bf16.gmra.8.mxu3  ;;  %v6299_v6 = vpop.f32.mrf.mxu0  ;;  %3015 = vmatpush.bf16.msra.mxu0 %v4420_v16  ;;  %v4457_v25 = vld [vmem:[%s5474_s21 + $0x438] sm:$0xf0] }
 0x1ac   : > { %2880 = vmatpush.bf16.msra.mxu3 %v4060_v62  ;;  %v2583_v34 = vadd.f32 %v6197_v53, %v2555_v3  ;;  %v4492_v53 = vor.u32 %v4989_v48, %v4489_v7  ;;  %v4965_v3 = vld [vmem:[%s5474_s21 + $0x3b4] sm:$0xf]  ;;  %v4963_v48 = vld [vmem:[%s5474_s21 + $0x3a4] sm:$0xf] }
 0x1ad   : > { %5220 = vmatmul.lmr.bf16.gmra.8.mxu2  ;;  %v4983_v7 = vld [vmem:[%s5474_s21 + $0x444] sm:$0xf] }
 0x1ae   : > { %5109 = vmatmul.lmr.bf16.gmra.8.mxu0  ;;  %v6308_v2 = vadd.f32 %v6222_v5, %v2583_v34  ;;  %3042 = vmatpush.bf16.msra.mxu1 %v4492_v53 }
 0x1af   : > { %3016 = vmatpush.bf16.msra.mxu0 %v4412_v30  ;;  %v4385_v30 = vld [vmem:[%s5474_s21 + $0x3a8] sm:$0xf0] }
 0x1b0   : > { %2881 = vmatpush.bf16.msra.mxu3 %v4052_v26 }
 0x1b1   : > { %v2557_v62 = vpop.f32.mrf.mxu3  ;;  %v2531_v31 = vpop.f32.mrf.mxu2 }
 0x1b2   : > { %v2558_v57 = vadd.f32 %v2557_v62, %v2530_v41  ;;  %v2532_v5 = vadd.f32 %v2531_v31, %v6192_v59  ;;  %v6319_v44 = vpop.f32.mrf.mxu1  ;;  %3043 = vmatpush.bf16.msra.mxu1 %v4484_v55  ;;  %v4396_v41 = vor.u32 %v4965_v3, %v4393_v22  ;;  %v4388_v62 = vor.u32 %v4963_v48, %v4385_v30  ;;  %v4465_v31 = vld [vmem:[%s5474_s21 + $0x448] sm:$0xf0]  ;;  %v4941_v3 = vld [vmem:[%s5474_s21 + $0x2f4] sm:$0xf]  ;;  %v4297_v22 = vld [vmem:[%s5474_s21 + $0x2f8] sm:$0xf0] }
 0x1b3   : > { %5281 = vmatmul.lmr.bf16.gmra.8.mxu3  ;;  %v6315_v60 = vpop.f32.mrf.mxu0  ;;  %3017 = vmatpush.bf16.msra.mxu0 %v4404_v21  ;;  %v4468_v8 = vor.u32 %v4983_v7, %v4465_v31  ;;  %v4300_v30 = vor.u32 %v4941_v3, %v4297_v22  ;;  %v4939_v31 = vld [vmem:[%s5474_s21 + $0x2e4] sm:$0xf]  ;;  %v4433_v22 = vld [vmem:[%s5474_s21 + $0x408] sm:$0xf0] }
 0x1b4   : > { %v2586_v26 = vadd.f32 %v6217_v63, %v2558_v57  ;;  %v4473_v63 = vld [vmem:[%s5474_s21 + $0x458] sm:$0xf0]  ;;  %5169 = vmatmul.lmr.bf16.gmra.8.mxu1 }
 0x1b5   : > { %v4476_v16 = vor.u32 %v4985_v35, %v4473_v63  ;;  %5221 = vmatmul.lmr.bf16.gmra.8.mxu2  ;;  %v4959_v63 = vld [vmem:[%s5474_s21 + $0x384] sm:$0xf] }
 0x1b6   : > { %5110 = vmatmul.lmr.bf16.gmra.8.mxu0  ;;  %v6325_v59 = vadd.f32 %v6241_v4, %v2586_v26 }
 0x1b7   : > { %3018 = vmatpush.bf16.msra.mxu0 %v4396_v41  ;;  %3044 = vmatpush.bf16.msra.mxu1 %v4476_v16  ;;  %v4369_v16 = vld [vmem:[%s5474_s21 + $0x388] sm:$0xf0] }
 0x1b9   : > { %v2559_v34 = vpop.f32.mrf.mxu3  ;;  %v2534_v12 = vpop.f32.mrf.mxu2 }
 0x1ba   : > { %v2560_v24 = vadd.f32 %v2559_v34, %v2532_v5  ;;  %v2535_v4 = vadd.f32 %v2534_v12, %v6212_v46  ;;  %v6336_v10 = vpop.f32.mrf.mxu1  ;;  %v4377_v5 = vld [vmem:[%s5474_s21 + $0x398] sm:$0xf0]  ;;  %v4981_v46 = vld [vmem:[%s5474_s21 + $0x434] sm:$0xf]  ;;  %v4372_v12 = vor.u32 %v4959_v63, %v4369_v16 }
 0x1bb   : > { %5282 = vmatmul.lmr.bf16.gmra.8.mxu3  ;;  %v6332_v53 = vpop.f32.mrf.mxu0  ;;  %3019 = vmatpush.bf16.msra.mxu0 %v4388_v62  ;;  %v4460_v26 = vor.u32 %v4981_v46, %v4457_v25  ;;  %v4361_v46 = vld [vmem:[%s5474_s21 + $0x378] sm:$0xf0] }
 0x1bc   : > { %v2588_v57 = vadd.f32 %v6237_v45, %v2560_v24  ;;  %3045 = vmatpush.bf16.msra.mxu1 %v4468_v8  ;;  %v4380_v45 = vor.u32 %v4961_v18, %v4377_v5  ;;  %v4449_v24 = vld [vmem:[%s5474_s21 + $0x428] sm:$0xf0]  ;;  %v4441_v8 = vld [vmem:[%s5474_s21 + $0x418] sm:$0xf0]  ;;  %v4957_v5 = vld [vmem:[%s5474_s21 + $0x374] sm:$0xf] }
 0x1bd   : > { %5170 = vmatmul.lmr.bf16.gmra.8.mxu1  ;;  %2854 = vmatmul.bf16.vlgmr.msra.gmra.mxu2 %v5763_v17  ;;  %v4364_v63 = vor.u32 %v4957_v5, %v4361_v46  ;;  %v4265_v5 = vld [vmem:[%s5474_s21 + $0x2b8] sm:$0xf0] }
 0x1be   : > { %5111 = vmatmul.lmr.bf16.gmra.8.mxu0  ;;  %v6342_v21 = vadd.f32 %v6258_v47, %v2588_v57  ;;  %v4979_v47 = vld [vmem:[%s5474_s21 + $0x424] sm:$0xf]  ;;  %v4977_v57 = vld [vmem:[%s5474_s21 + $0x414] sm:$0xf]  ;;  %2958 = vmatpush.bf16.msra.mxu2 %v4300_v30 }
 0x1bf   : > { %3020 = vmatpush.bf16.msra.mxu0 %v4380_v45  ;;  %v4452_v7 = vor.u32 %v4979_v47, %v4449_v24  ;;  %v4955_v47 = vld [vmem:[%s5474_s21 + $0x364] sm:$0xf] }
 0x1c0   : > { %3046 = vmatpush.bf16.msra.mxu1 %v4460_v26  ;;  %v4937_v26 = vld [vmem:[%s5474_s21 + $0x2d4] sm:$0xf]  ;;  %v4935_v30 = vld [vmem:[%s5474_s21 + $0x2c4] sm:$0xf] }
 0x1c1   : > { %v2562_v55 = vpop.f32.mrf.mxu3  ;;  %v2536_v35 = vpop.f32.mrf.mxu2 }
 0x1c2   : > { %v2563_v41 = vadd.f32 %v2562_v55, %v2535_v4  ;;  %v6354_v62 = vpop.f32.mrf.mxu1  ;;  %v4289_v4 = vld [vmem:[%s5474_s21 + $0x2e8] sm:$0xf0]  ;;  %v4281_v55 = vld [vmem:[%s5474_s21 + $0x2d8] sm:$0xf0] }
 0x1c3   : > { %5283 = vmatmul.lmr.bf16.gmra.8.mxu3  ;;  %v6350_v34 = vpop.f32.mrf.mxu0  ;;  %3021 = vmatpush.bf16.msra.mxu0 %v4372_v12  ;;  %v4292_v45 = vor.u32 %v4939_v31, %v4289_v4  ;;  %v4353_v12 = vld [vmem:[%s5474_s21 + $0x368] sm:$0xf0]  ;;  %v4284_v24 = vor.u32 %v4937_v26, %v4281_v55  ;;  %v4953_v31 = vld [vmem:[%s5474_s21 + $0x354] sm:$0xf]  ;;  %v4345_v4 = vld [vmem:[%s5474_s21 + $0x358] sm:$0xf0] }
 0x1c4   : > { %v2591_v48 = vadd.f32 %v6251_v39, %v2563_v41  ;;  %3047 = vmatpush.bf16.msra.mxu1 %v4452_v7  ;;  %v4444_v39 = vor.u32 %v4977_v57, %v4441_v8  ;;  %v1253_v41 = vpop.trf.xlu1  ;;  %v4273_v7 = vld [vmem:[%s5474_s21 + $0x2c8] sm:$0xf0]  ;;  %v4348_v55 = vor.u32 %v4953_v31, %v4345_v4 }
 0x1c5   : > { %5171 = vmatmul.lmr.bf16.gmra.8.mxu1  ;;  %2959 = vmatpush.bf16.msra.mxu2 %v4292_v45  ;;  %v4276_v57 = vor.u32 %v4935_v30, %v4273_v7 }
 0x1c6   : > { %5112 = vmatmul.lmr.bf16.gmra.8.mxu0  ;;  %v6361_v18 = vadd.f32 %v6273_v32, %v2591_v48  ;;  %v4975_v32 = vld [vmem:[%s5474_s21 + $0x404] sm:$0xf] }
 0x1c7   : > { %v4436_v16 = vor.u32 %v4975_v32, %v4433_v22  ;;  %v4951_v32 = vld [vmem:[%s5474_s21 + $0x344] sm:$0xf]  ;;  %v4337_v22 = vld [vmem:[%s5474_s21 + $0x348] sm:$0xf0] }
 0x1c8   : > { %3048 = vmatpush.bf16.msra.mxu1 %v4444_v39  ;;  %v4933_v39 = vld [vmem:[%s5474_s21 + $0x2b4] sm:$0xf] }
 0x1c9   : > { %v2564_v25 = vpop.f32.mrf.mxu3  ;;  %v2631_v3 = vpop.f32.mrf.mxu2  ;;  %2960 = vmatpush.bf16.msra.mxu2 %v4284_v24 }
 0x1ca   : > { %v2632_v17 = vadd.f32 %v2631_v3, %v6265_v0  ;;  %v6375_v48 = vpop.f32.mrf.mxu1  ;;  %v4356_v0 = vor.u32 %v4955_v47, %v4353_v12  ;;  %v4257_v47 = vld [vmem:[%s5474_s21 + $0x2a8] sm:$0xf0]  ;;  %v4329_v12 = vld [vmem:[%s5474_s21 + $0x338] sm:$0xf0] }
 0x1cb   : > { %5284 = vmatmul.lmr.bf16.gmra.8.mxu3  ;;  %v6371_v35 = vpop.f32.mrf.mxu0 }
 0x1cc   : > { %5230 = vllmr.8.mxu2  ;;  %3049 = vmatpush.bf16.msra.mxu1 %v4436_v16  ;;  %v4931_v16 = vld [vmem:[%s5474_s21 + $0x2a4] sm:$0xf]  ;;  %v1254_v4 = vpop.trf.xlu1 }
 0x1cd   : > { %5172 = vmatmul.lmr.bf16.gmra.8.mxu1  ;;  %2961 = vmatpush.bf16.msra.mxu2 %v4276_v57  ;;  %v4260_v24 = vor.u32 %v4931_v16, %v4257_v47  ;;  %v4927_v16 = vld [vmem:[%s5474_s21 + $0x284] sm:$0xf]  ;;  %v4241_v47 = vld [vmem:[%s5474_s21 + $0x288] sm:$0xf0] }
 0x1ce   : > { %5113 = vmatmul.lmr.bf16.gmra.8.mxu0  ;;  %2859 = vmatmul.bf16.gmra.mxu2 %v5802_v51 }
 0x1d1   : > { %v2659_v8 = vpop.f32.mrf.mxu3  ;;  %v2633_v46 = vpop.f32.mrf.mxu2 }
 0x1d2   : > { %5293 = vllmr.8.mxu3  ;;  %v2660_v45 = vadd.f32 %v2659_v8, %v2632_v17  ;;  %v2634_v25 = vadd.f32 %v2633_v46, %v6278_v28  ;;  %v4340_v28 = vor.u32 %v4951_v32, %v4337_v22  ;;  %v4947_v8 = vld [vmem:[%s5474_s21 + $0x324] sm:$0xf]  ;;  %v4929_v46 = vld [vmem:[%s5474_s21 + $0x294] sm:$0xf] }
 0x1d3   : > { %2882 = vmatmul.bf16.vlgmr.msra.gmra.mxu3 %v1253_v41  ;;  %v6384_v26 = vpop.f32.mrf.mxu0  ;;  %v4268_v41 = vor.u32 %v4933_v39, %v4265_v5  ;;  %v4321_v39 = vld [vmem:[%s5474_s21 + $0x328] sm:$0xf0] }
 0x1d4   : > { %2986 = vmatpush.bf16.msra.mxu3 %v4364_v63  ;;  %v2688_v3 = vadd.f32 %v6286_v20, %v2660_v45  ;;  %v6389_v63 = vpop.f32.mrf.mxu1  ;;  %v4949_v20 = vld [vmem:[%s5474_s21 + $0x334] sm:$0xf]  ;;  %v4249_v45 = vld [vmem:[%s5474_s21 + $0x298] sm:$0xf0] }
 0x1d5   : > { %5173 = vmatmul.lmr.bf16.gmra.8.mxu1  ;;  %2962 = vmatpush.bf16.msra.mxu2 %v4268_v41  ;;  %v4332_v51 = vor.u32 %v4949_v20, %v4329_v12  ;;  %v4244_v12 = vor.u32 %v4927_v16, %v4241_v47  ;;  %v5047_v47 = vld [vmem:[%s5474_s21 + $0x644] sm:$0xf] }
 0x1d6   : > { %5114 = vmatmul.lmr.bf16.gmra.8.mxu0  ;;  %v6394_v17 = vadd.f32 %v6302_v43, %v2688_v3  ;;  %v4313_v3 = vld [vmem:[%s5474_s21 + $0x318] sm:$0xf0] }
 0x1d8   : > { %2987 = vmatpush.bf16.msra.mxu3 %v4356_v0 }
 0x1d9   : > { %v2661_v30 = vpop.f32.mrf.mxu3  ;;  %v2636_v7 = vpop.f32.mrf.mxu2  ;;  %2963 = vmatpush.bf16.msra.mxu2 %v4260_v24 }
 0x1da   : > { %v2662_v0 = vadd.f32 %v2661_v30, %v2634_v25  ;;  %v2637_v31 = vadd.f32 %v2636_v7, %v6292_v19  ;;  %v4252_v19 = vor.u32 %v4929_v46, %v4249_v45 }
 0x1db   : > { %v2704_v43 = vpop.f32.mrf.mxu0 }
 0x1dc   : > { %2988 = vmatpush.bf16.msra.mxu3 %v4348_v55  ;;  %v2690_v57 = vadd.f32 %v6299_v6, %v2662_v0  ;;  %v6403_v5 = vpop.f32.mrf.mxu1  ;;  %v4324_v55 = vor.u32 %v4947_v8, %v4321_v39  ;;  %v4945_v6 = vld [vmem:[%s5474_s21 + $0x314] sm:$0xf]  ;;  %v4943_v0 = vld [vmem:[%s5474_s21 + $0x304] sm:$0xf]  ;;  %v1255_v8 = vpop.trf.xlu1 }
 0x1dd   : > { %5174 = vmatmul.lmr.bf16.gmra.8.mxu1  ;;  %2964 = vmatpush.bf16.msra.mxu2 %v4252_v19 }
 0x1de   : > { %5115 = vmatmul.lmr.bf16.gmra.8.mxu0  ;;  %v6408_v25 = vadd.f32 %v6319_v44, %v2690_v57  ;;  %v4316_v44 = vor.u32 %v4945_v6, %v4313_v3  ;;  %2864 = vmatmul.bf16.gmra.mxu2 %v5835_v27  ;;  %v4729_v6 = vld [vmem:[%s5474_s21 + $0x658] sm:$0xf0] }
 0x1e0   : > { %2989 = vmatpush.bf16.msra.mxu3 %v4340_v28 }
 0x1e1   : > { %v2664_v32 = vpop.f32.mrf.mxu3  ;;  %v2638_v22 = vpop.f32.mrf.mxu2  ;;  %2965 = vmatpush.bf16.msra.mxu2 %v4244_v12 }
 0x1e2   : > { %v2665_v41 = vadd.f32 %v2664_v32, %v2637_v31  ;;  %v2639_v28 = vadd.f32 %v2638_v22, %v6308_v2  ;;  %v4305_v2 = vld [vmem:[%s5474_s21 + $0x308] sm:$0xf0] }
 0x1e3   : > { %2887 = vmatmul.bf16.gmra.mxu3 %v1254_v4  ;;  %v6415_v20 = vpop.f32.mrf.mxu0  ;;  %v4308_v31 = vor.u32 %v4943_v0, %v4305_v2  ;;  %v5035_v2 = vld [vmem:[%s5474_s21 + $0x5e4] sm:$0xf] }
 0x1e4   : > { %2990 = vmatpush.bf16.msra.mxu3 %v4332_v51  ;;  %v2693_v24 = vadd.f32 %v6315_v60, %v2665_v41  ;;  %v2732_v30 = vpop.f32.mrf.mxu1 }
 0x1e5   : > { %5124 = vllmr.8.mxu0  ;;  %5175 = vmatmul.lmr.bf16.gmra.8.mxu1  ;;  %v5045_v30 = vld [vmem:[%s5474_s21 + $0x634] sm:$0xf] }
 0x1e6   : > { %3022 = vmatmul.bf16.vlgmr.msra.gmra.mxu0 %v6010_v37  ;;  %v6420_v7 = vadd.f32 %v6336_v10, %v2693_v24 }
 0x1e8   : > { %2991 = vmatpush.bf16.msra.mxu3 %v4324_v55 }
 0x1e9   : > { %v2666_v43 = vpop.f32.mrf.mxu3  ;;  %v2641_v4 = vpop.f32.mrf.mxu2 }
 0x1ea   : > { %v2667_v51 = vadd.f32 %v2666_v43, %v2639_v28  ;;  %v2642_v60 = vadd.f32 %v2641_v4, %v6325_v59  ;;  %v5005_v4 = vld [vmem:[%s5474_s21 + $0x4f4] sm:$0xf] }
 0x1eb   : > { %v6426_v57 = vpop.f32.mrf.mxu0 }
 0x1ec   : > { %2992 = vmatpush.bf16.msra.mxu3 %v4316_v44  ;;  %v2695_v37 = vadd.f32 %v6332_v53, %v2667_v51  ;;  %v6429_v10 = vpop.f32.mrf.mxu1  ;;  %v4673_v51 = vld [vmem:[%s5474_s21 + $0x5e8] sm:$0xf0] }
 0x1ed   : > { %3050 = vmatmul.bf16.vlgmr.msra.gmra.mxu1 %v5916_v29  ;;  %v5037_v29 = vld [vmem:[%s5474_s21 + $0x5f4] sm:$0xf] }
 0x1ee   : > { %v6432_v27 = vadd.f32 %v6354_v62, %v2695_v37  ;;  %v5049_v62 = vld [vmem:[%s5474_s21 + $0x654] sm:$0xf]  ;;  %2869 = vmatmul.bf16.gmra.mxu2 %v5874_v23  ;;  %v1256_v23 = vpop.trf.xlu1  ;;  %v4676_v37 = vor.u32 %v5035_v2, %v4673_v51  ;;  %v4999_v51 = vld [vmem:[%s5474_s21 + $0x4c4] sm:$0xf] }
 0x1ef   : > { %v4732_v32 = vor.u32 %v5049_v62, %v4729_v6  ;;  %v5003_v62 = vld [vmem:[%s5474_s21 + $0x4e4] sm:$0xf]  ;;  %v4545_v6 = vld [vmem:[%s5474_s21 + $0x4e8] sm:$0xf0] }
 0x1f0   : > { %2993 = vmatpush.bf16.msra.mxu3 %v4308_v31 }
 0x1f1   : > { %v2669_v39 = vpop.f32.mrf.mxu3  ;;  %v2643_v59 = vpop.f32.mrf.mxu2  ;;  %3156 = vmatpush.bf16.msra.mxu1 %v4732_v32 }
 0x1f2   : > { %v2670_v46 = vadd.f32 %v2669_v39, %v2642_v60  ;;  %v2644_v45 = vadd.f32 %v2643_v59, %v6342_v21  ;;  %v4681_v21 = vld [vmem:[%s5474_s21 + $0x5f8] sm:$0xf0]  ;;  %v5043_v39 = vld [vmem:[%s5474_s21 + $0x624] sm:$0xf] }
 0x1f3   : > { %2892 = vmatmul.bf16.gmra.mxu3 %v1255_v8  ;;  %v6436_v19 = vpop.f32.mrf.mxu0  ;;  %v4684_v41 = vor.u32 %v5037_v29, %v4681_v21  ;;  %v5041_v29 = vld [vmem:[%s5474_s21 + $0x614] sm:$0xf] }
 0x1f4   : > { %v2698_v53 = vadd.f32 %v6350_v34, %v2670_v46  ;;  %v6439_v55 = vpop.f32.mrf.mxu1  ;;  %v5033_v21 = vld [vmem:[%s5474_s21 + $0x5d4] sm:$0xf] }
 0x1f5   : > { %3126 = vmatpush.bf16.msra.mxu0 %v4684_v41  ;;  %v4548_v41 = vor.u32 %v5003_v62, %v4545_v6  ;;  %v4997_v62 = vld [vmem:[%s5474_s21 + $0x4b4] sm:$0xf]  ;;  %v4521_v6 = vld [vmem:[%s5474_s21 + $0x4b8] sm:$0xf0] }
 0x1f6   : > { %3027 = vmatmul.bf16.gmra.mxu0 %v6081_v50  ;;  %v6445_v3 = vadd.f32 %v6375_v48, %v2698_v53  ;;  %v4721_v50 = vld [vmem:[%s5474_s21 + $0x648] sm:$0xf0] }
 0x1f7   : > { %v4724_v44 = vor.u32 %v5047_v47, %v4721_v50  ;;  %v5001_v50 = vld [vmem:[%s5474_s21 + $0x4d4] sm:$0xf] }
 0x1f9   : > { %v2671_v22 = vpop.f32.mrf.mxu3  ;;  %v2646_v34 = vpop.f32.mrf.mxu2  ;;  %3157 = vmatpush.bf16.msra.mxu1 %v4724_v44  ;;  %3127 = vmatpush.bf16.msra.mxu0 %v4676_v37  ;;  %v5039_v44 = vld [vmem:[%s5474_s21 + $0x604] sm:$0xf] }
 0x1fa   : > { %v2672_v16 = vadd.f32 %v2671_v22, %v2644_v45  ;;  %v2647_v28 = vadd.f32 %v2646_v34, %v6361_v18  ;;  %v4713_v18 = vld [vmem:[%s5474_s21 + $0x638] sm:$0xf0]  ;;  %v5031_v37 = vld [vmem:[%s5474_s21 + $0x5c4] sm:$0xf] }
 0x1fb   : > { %v6453_v48 = vpop.f32.mrf.mxu0  ;;  %v4716_v31 = vor.u32 %v5045_v30, %v4713_v18  ;;  %v4617_v22 = vld [vmem:[%s5474_s21 + $0x578] sm:$0xf0] }
 0x1fc   : > { %v2700_v12 = vadd.f32 %v6371_v35, %v2672_v16  ;;  %v6456_v24 = vpop.f32.mrf.mxu1  ;;  %v4553_v35 = vld [vmem:[%s5474_s21 + $0x4f8] sm:$0xf0] }
 0x1fd   : > { %3055 = vmatmul.bf16.gmra.mxu1 %v5940_v56  ;;  %v4556_v45 = vor.u32 %v5005_v4, %v4553_v35  ;;  %v4665_v34 = vld [vmem:[%s5474_s21 + $0x5d8] sm:$0xf0] }
 0x1fe   : > { %v6460_v0 = vadd.f32 %v6389_v63, %v2700_v12  ;;  %3158 = vmatpush.bf16.msra.mxu1 %v4716_v31  ;;  %v4705_v63 = vld [vmem:[%s5474_s21 + $0x628] sm:$0xf0]  ;;  %5231 = vmatmul.lmr.bf16.vlgmr.msra.gmra.8.mxu2  ;;  %v4697_v16 = vld [vmem:[%s5474_s21 + $0x618] sm:$0xf0]  ;;  %v5019_v31 = vld [vmem:[%s5474_s21 + $0x564] sm:$0xf] }
 0x1ff   : > { %v4708_v56 = vor.u32 %v5043_v39, %v4705_v63  ;;  %3070 = vmatpush.bf16.msra.mxu2 %v4556_v45  ;;  %v4689_v12 = vld [vmem:[%s5474_s21 + $0x608] sm:$0xf0]  ;;  %v5017_v39 = vld [vmem:[%s5474_s21 + $0x554] sm:$0xf]  ;;  %v4601_v63 = vld [vmem:[%s5474_s21 + $0x558] sm:$0xf0] }
 0x201   : > { %v2648_v60 = vpop.f32.mrf.mxu2 }
 0x202   : > { %3159 = vmatpush.bf16.msra.mxu1 %v4708_v56  ;;  %v4529_v60 = vld [vmem:[%s5474_s21 + $0x4c8] sm:$0xf0] }
 0x203   : > { %2897 = vmatmul.bf16.gmra.mxu3 %v1256_v23  ;;  %v6470_v59 = vpop.f32.mrf.mxu0  ;;  %v4700_v23 = vor.u32 %v5041_v29, %v4697_v16  ;;  %3071 = vmatpush.bf16.msra.mxu2 %v4548_v41  ;;  %v4532_v56 = vor.u32 %v4999_v51, %v4529_v60  ;;  %v5015_v41 = vld [vmem:[%s5474_s21 + $0x544] sm:$0xf]  ;;  %v4524_v16 = vor.u32 %v4997_v62, %v4521_v6  ;;  %v4569_v62 = vld [vmem:[%s5474_s21 + $0x518] sm:$0xf0]  ;;  %v4641_v6 = vld [vmem:[%s5474_s21 + $0x5a8] sm:$0xf0] }
 0x204   : > { %v6473_v53 = vpop.f32.mrf.mxu1 }
 0x206   : > { %v2674_v43 = vpop.f32.mrf.mxu3  ;;  %3032 = vmatmul.bf16.gmra.mxu0 %v6139_v61  ;;  %v4537_v61 = vld [vmem:[%s5474_s21 + $0x4d8] sm:$0xf0]  ;;  %3160 = vmatpush.bf16.msra.mxu1 %v4700_v23  ;;  %v5013_v23 = vld [vmem:[%s5474_s21 + $0x534] sm:$0xf] }
 0x207   : > { %v2675_v8 = vadd.f32 %v2674_v43, %v2647_v28  ;;  %v4668_v28 = vor.u32 %v5033_v21, %v4665_v34  ;;  %v4609_v43 = vld [vmem:[%s5474_s21 + $0x568] sm:$0xf0]  ;;  %v4540_v4 = vor.u32 %v5001_v50, %v4537_v61  ;;  %5232 = vmatmul.lmr.bf16.gmra.8.mxu2  ;;  %v4995_v50 = vld [vmem:[%s5474_s21 + $0x4a4] sm:$0xf] }
 0x208   : > { %v4593_v34 = vld [vmem:[%s5474_s21 + $0x548] sm:$0xf0] }
 0x209   : > { %v2703_v46 = vadd.f32 %v6384_v26, %v2675_v8  ;;  %v5021_v26 = vld [vmem:[%s5474_s21 + $0x574] sm:$0xf]  ;;  %3128 = vmatpush.bf16.msra.mxu0 %v4668_v28  ;;  %v4612_v8 = vor.u32 %v5019_v31, %v4609_v43  ;;  %3072 = vmatpush.bf16.msra.mxu2 %v4540_v4  ;;  %v4513_v61 = vld [vmem:[%s5474_s21 + $0x4a8] sm:$0xf0] }
 0x20a   : > { %v4620_v2 = vor.u32 %v5021_v26, %v4617_v22  ;;  %v4604_v22 = vor.u32 %v5017_v39, %v4601_v63  ;;  %v5029_v28 = vld [vmem:[%s5474_s21 + $0x5b4] sm:$0xf] }
 0x20b   : > { %v6480_v32 = vadd.f32 %v6403_v5, %v2703_v46  ;;  %v2743_v5 = vpop.f32.mrf.mxu2  ;;  %v6492_v18 = vpop.f32.mrf.mxu0  ;;  %v4657_v46 = vld [vmem:[%s5474_s21 + $0x5c8] sm:$0xf0]  ;;  %v4993_v63 = vld [vmem:[%s5474_s21 + $0x494] sm:$0xf] }
 0x20c   : > { %v2744_v30 = vadd.f32 %v2743_v5, %v6394_v17  ;;  %v6496_v35 = vpop.f32.mrf.mxu1  ;;  %v4692_v17 = vor.u32 %v5039_v44, %v4689_v12  ;;  %v4585_v5 = vld [vmem:[%s5474_s21 + $0x538] sm:$0xf0]  ;;  %v4516_v44 = vor.u32 %v4995_v50, %v4513_v61 }
 0x20d   : > { %3060 = vmatmul.bf16.gmra.mxu1 %v6008_v36  ;;  %3073 = vmatpush.bf16.msra.mxu2 %v4532_v56  ;;  %v4649_v12 = vld [vmem:[%s5474_s21 + $0x5b8] sm:$0xf0]  ;;  %v4588_v51 = vor.u32 %v5013_v23, %v4585_v5  ;;  %v5007_v5 = vld [vmem:[%s5474_s21 + $0x504] sm:$0xf] }
 0x20e   : > { %v2676_v47 = vpop.f32.mrf.mxu3  ;;  %3161 = vmatpush.bf16.msra.mxu1 %v4692_v17 }
 0x20f   : > { %5233 = vmatmul.lmr.bf16.gmra.8.mxu2 }
 0x211   : > { %3074 = vmatpush.bf16.msra.mxu2 %v4524_v16 }
 0x213   : > { %2994 = vmatmul.bf16.vlgmr.msra.gmra.mxu3 %v5977_v13  ;;  %v4660_v13 = vor.u32 %v5031_v37, %v4657_v46  ;;  %v2745_v29 = vpop.f32.mrf.mxu2  ;;  %v6509_v36 = vpop.f32.mrf.mxu0  ;;  %v4577_v37 = vld [vmem:[%s5474_s21 + $0x528] sm:$0xf0]  ;;  %v5027_v46 = vld [vmem:[%s5474_s21 + $0x5a4] sm:$0xf] }
 0x214   : > { %3098 = vmatpush.bf16.msra.mxu3 %v4620_v2  ;;  %v2746_v21 = vadd.f32 %v2745_v29, %v6408_v25  ;;  %v6513_v47 = vpop.f32.mrf.mxu1  ;;  %v4596_v25 = vor.u32 %v5015_v41, %v4593_v34  ;;  %v4652_v2 = vor.u32 %v5029_v28, %v4649_v12  ;;  %v4644_v29 = vor.u32 %v5027_v46, %v4641_v6 }
 0x215   : > { %3129 = vmatpush.bf16.msra.mxu0 %v4660_v13  ;;  %3075 = vmatpush.bf16.msra.mxu2 %v4516_v44  ;;  %v4561_v44 = vld [vmem:[%s5474_s21 + $0x508] sm:$0xf0] }
 0x216   : > { %v2771_v45 = vpop.f32.mrf.mxu3  ;;  %3037 = vmatmul.bf16.gmra.mxu0 %v6199_v14 }
 0x217   : > { %v2772_v26 = vadd.f32 %v2771_v45, %v2744_v30  ;;  %5234 = vmatmul.lmr.bf16.gmra.8.mxu2  ;;  %v5009_v45 = vld [vmem:[%s5474_s21 + $0x514] sm:$0xf] }
 0x218   : > { %3099 = vmatpush.bf16.msra.mxu3 %v4612_v8  ;;  %v5011_v8 = vld [vmem:[%s5474_s21 + $0x524] sm:$0xf]  ;;  %v4572_v16 = vor.u32 %v5009_v45, %v4569_v62 }
 0x219   : > { %3130 = vmatpush.bf16.msra.mxu0 %v4652_v2  ;;  %v6524_v60 = vadd.f32 %v6415_v20, %v2772_v26  ;;  %v4505_v20 = vld [vmem:[%s5474_s21 + $0x498] sm:$0xf0] }
 0x21a   : > { %v4508_v56 = vor.u32 %v4993_v63, %v4505_v20 }
 0x21b   : > { %v2748_v31 = vpop.f32.mrf.mxu2  ;;  %v2816_v4 = vpop.f32.mrf.mxu0 }
 0x21c   : > { %3100 = vmatpush.bf16.msra.mxu3 %v4604_v22  ;;  %v2749_v14 = vadd.f32 %v2748_v31, %v6420_v7  ;;  %v6531_v39 = vpop.f32.mrf.mxu1  ;;  %3076 = vmatpush.bf16.msra.mxu2 %v4508_v56  ;;  %v4497_v22 = vld [vmem:[%s5474_s21 + $0x488] sm:$0xf0]  ;;  %v4633_v4 = vld [vmem:[%s5474_s21 + $0x598] sm:$0xf0] }
 0x21d   : > { %3065 = vmatmul.bf16.gmra.mxu1 %v6079_v49  ;;  %3131 = vmatpush.bf16.msra.mxu0 %v4644_v29 }
 0x21e   : > { %v2773_v30 = vpop.f32.mrf.mxu3 }
 0x21f   : > { %v2774_v43 = vadd.f32 %v2773_v30, %v2746_v21  ;;  %5235 = vmatmul.lmr.bf16.gmra.8.mxu2 }
 0x220   : > { %3101 = vmatpush.bf16.msra.mxu3 %v4596_v25 }
 0x221   : > { %v6527_v17 = vadd.f32 %v6426_v57, %v2774_v43  ;;  %v4580_v57 = vor.u32 %v5011_v8, %v4577_v37 }
 0x223   : > { %v3182_v7 = vadd.f32 %v6527_v17, %v6524_v60  ;;  %2999 = vmatmul.bf16.gmra.mxu3 %v6054_v15  ;;  %v2750_v26 = vpop.f32.mrf.mxu2  ;;  %v4991_v15 = vld [vmem:[%s5474_s21 + $0x484] sm:$0xf]  ;;  %v6546_v34 = vpop.f32.mrf.mxu0 }
 0x224   : > { %3102 = vmatpush.bf16.msra.mxu3 %v4588_v51  ;;  %v2751_v41 = vadd.f32 %v2750_v26, %v6432_v27  ;;  %v4500_v49 = vor.u32 %v4991_v15, %v4497_v22  ;;  %v2844_v61 = vpop.f32.mrf.mxu1 }
 0x226   : > { %v2776_v13 = vpop.f32.mrf.mxu3  ;;  %3077 = vmatpush.bf16.msra.mxu2 %v4500_v49 }
 0x227   : > { %v2777_v21 = vadd.f32 %v2776_v13, %v2749_v14  ;;  %v5025_v14 = vld [vmem:[%s5474_s21 + $0x594] sm:$0xf]  ;;  %5236 = vmatmul.lmr.bf16.gmra.8.mxu2 }
 0x228   : > { %3103 = vmatpush.bf16.msra.mxu3 %v4580_v57  ;;  %v4636_v51 = vor.u32 %v5025_v14, %v4633_v4 }
 0x229   : > { %v6549_v50 = vadd.f32 %v6436_v19, %v2777_v21  ;;  %v4564_v19 = vor.u32 %v5007_v5, %v4561_v44 }
 0x22a   : > { %3132 = vmatpush.bf16.msra.mxu0 %v4636_v51 }
 0x22b   : > { %v3183_v25 = vadd.f32 %v3182_v7, %v6549_v50  ;;  %v2753_v27 = vpop.f32.mrf.mxu2  ;;  %v6555_v30 = vpop.f32.mrf.mxu0  ;;  %v4625_v7 = vld [vmem:[%s5474_s21 + $0x588] sm:$0xf0] }
 0x22c   : > { %3104 = vmatpush.bf16.msra.mxu3 %v4572_v16  ;;  %v2754_v12 = vadd.f32 %v2753_v27, %v6445_v3  ;;  %v6560_v31 = vpop.f32.mrf.mxu1 }
 0x22d   : > { %4737 = vmatmul.msk.bf16.vlgmr.msra.gmra.mxu1 %vm2441_vm0, %v6125_v58 }
 0x22e   : > { %v2778_v28 = vpop.f32.mrf.mxu3 }
 0x22f   : > { %v2779_v23 = vadd.f32 %v2778_v28, %v2751_v41  ;;  %5237 = vmatmul.lmr.bf16.gmra.8.mxu2 }
 0x230   : > { %3105 = vmatpush.bf16.msra.mxu3 %v4564_v19 }
 0x231   : > { %v6558_v2 = vadd.f32 %v6453_v48, %v2779_v23  ;;  %v5023_v48 = vld [vmem:[%s5474_s21 + $0x584] sm:$0xf]  ;;  %s4744_s21 = sshll.u32 %s5462_s11, 2  ;;  %s186_s11 = smul.u32 17, %s5420_s13 }
 0x232   : > { %v4628_v57 = vor.u32 %v5023_v48, %v4625_v7  ;;  %s185_s9 = scalar_lea.vmem %s6780_s2, %s4744_s21 }
 0x233   : > { %v3184_v43 = vadd.f32 %v3183_v25, %v6558_v2  ;;  %3004 = vmatmul.bf16.gmra.mxu3 %v6109_v54  ;;  %v2755_v8 = vpop.f32.mrf.mxu2  ;;  %v6571_v20 = vpop.f32.mrf.mxu0  ;;  %p187_p4 = scmp.lt.s32.totalorder %s186_s11, 33 }
 0x234   : > { %v2756_v63 = vadd.f32 %v2755_v8, %v6460_v0  ;;  %v6574_v56 = vpop.f32.mrf.mxu1  ;;  %3133 = vmatpush.bf16.msra.mxu0 %v4628_v57 }
 0x235   : > { %s6783_s11 = smov (!%p187_p4, %s186_s11), 33 }
 0x236   : > { %v2781_v3 = vpop.f32.mrf.mxu3  ;;  %s3508_s10 = sshll.u32 %s6783_s11, 3 }
 0x237   : > { %v2782_v37 = vadd.f32 %v2781_v3, %v2754_v12  ;;  %5125 = vmatmul.lmr.bf16.vlgmr.msra.gmra.8.mxu0  ;;  %5238 = vmatmul.lmr.bf16.gmra.8.mxu2  ;;  %s6739_s16 = scalar_lea.vmem %s6781_s3, %s3508_s10 }
 0x239   : > { %v2810_v54 = vadd.f32 %v6470_v59, %v2782_v37 }
 0x23b   : > { %v3185_v46 = vadd.f32 %v3184_v43, %v2810_v54  ;;  %v2758_v45 = vpop.f32.mrf.mxu2  ;;  %v6577_v13 = vpop.f32.mrf.mxu0 }
 0x23c   : > { %v2759_v6 = vadd.f32 %v2758_v45, %v6480_v32  ;;  %v6580_v29 = vpop.f32.mrf.mxu1 }
 0x23d   : > { %4738 = vmatmul.msk.bf16.gmra.mxu1 %vm2441_vm0, %v6179_v52 }
 0x23e   : > { %v2783_v58 = vpop.f32.mrf.mxu3 }
 0x23f   : > { %v2784_v62 = vadd.f32 %v2783_v58, %v2756_v63  ;;  %5126 = vmatmul.lmr.bf16.gmra.8.mxu0  ;;  %3078 = vmatmul.bf16.vlgmr.msra.gmra.mxu2 %v5925_v42 }
 0x241   : > { %v2812_v0 = vadd.f32 %v6492_v18, %v2784_v62 }
 0x243   : > { %v3186_v26 = vadd.f32 %v3185_v46, %v2812_v0  ;;  %3009 = vmatmul.bf16.gmra.mxu3 %v6169_v33  ;;  %v2760_v21 = vpop.f32.mrf.mxu2  ;;  %v6585_v22 = vpop.f32.mrf.mxu0 }
 0x244   : > { %v6588_v41 = vpop.f32.mrf.mxu1 }
 0x246   : > { %v2786_v59 = vpop.f32.mrf.mxu3 }
 0x247   : > { %v2787_v15 = vadd.f32 %v2786_v59, %v2759_v6  ;;  %5127 = vmatmul.lmr.bf16.gmra.8.mxu0 }
 0x249   : > { %v2815_v32 = vadd.f32 %v6509_v36, %v2787_v15 }
 0x24b   : > { %v3188_v18 = vsel %vm3187_vm1, %v2815_v32, 0.0  ;;  %v2855_v52 = vpop.f32.mrf.mxu2  ;;  %v6592_v25 = vpop.f32.mrf.mxu0 }
 0x24c   : > { %v3189_v16 = vadd.f32 %v3188_v18, %v3186_v26  ;;  %v6594_v27 = vpop.f32.mrf.mxu1  ;;  %v2856_v36 = vadd.f32 %v2855_v52, %v6429_v10 }
 0x24d   : > { %4739 = vmatmul.msk.bf16.gmra.mxu1 %vm2441_vm0, %v6219_v1 }
 0x24e   : > { %v3190_v33 = vrot.slane %v3189_v16, 4  ;;  %v2788_v49 = vpop.f32.mrf.mxu3 }
 0x24f   : > { %5128 = vmatmul.lmr.bf16.gmra.8.mxu0  ;;  %3083 = vmatmul.bf16.gmra.mxu2 %v5975_v11 }
 0x250   : > { %v3191_v61 = vadd.f32 %v3190_v33, %v3189_v16 }
 0x252   : > { %v3192_v28 = vrot.slane %v3191_v61, 2 }
 0x253   : > { %5294 = vmatmul.lmr.bf16.vlgmr.msra.gmra.8.mxu3  ;;  %v2857_v44 = vpop.f32.mrf.mxu2  ;;  %v6599_v43 = vpop.f32.mrf.mxu0 }
 0x254   : > { %v3193_v23 = vadd.f32 %v3192_v28, %v3191_v61  ;;  %v6602_v51 = vpop.f32.mrf.mxu1 }
 0x256   : > { %v3194_v5 = vrot.slane %v3193_v23, 1  ;;  %v2883_v42 = vpop.f32.mrf.mxu3 }
 0x257   : > { %v2884_v12 = vadd.f32 %v2883_v42, %v2856_v36  ;;  %5129 = vmatmul.lmr.bf16.gmra.8.mxu0 }
 0x258   : > { %v3195_v19 = vadd.f32 %v3194_v5, %v3193_v23 }
 0x259   : > { %v2912_v14 = vadd.f32 %v6546_v34, %v2884_v12  ;;  %v2858_v34 = vadd.f32 %v2857_v44, %v6439_v55 }
 0x25a   : > { %v3217_v4 = vmul.f32 0.020408163, %v3195_v19 }
 0x25b   : > { %5295 = vmatmul.lmr.bf16.gmra.8.mxu3  ;;  %v6605_v3 = vadd.f32 %v6560_v31, %v2912_v14  ;;  %v2860_v63 = vpop.f32.mrf.mxu2  ;;  %v2928_v57 = vpop.f32.mrf.mxu0 }
 0x25c   : > { %v6607_v10 = vsub.f32 %v2815_v32, %v3217_v4  ;;  %v6611_v1 = vsub.f32 %v6524_v60, %v3217_v4  ;;  %v6614_v8 = vsub.f32 %v6527_v17, %v3217_v4  ;;  %v6617_v37 = vsub.f32 %v6549_v50, %v3217_v4 }
 0x25d   : > { %v6621_v48 = vsub.f32 %v6558_v2, %v3217_v4  ;;  %v6623_v31 = vsub.f32 %v2810_v54, %v3217_v4  ;;  %v6625_v7 = vsub.f32 %v2812_v0, %v3217_v4  ;;  %v2954_v2 = vpop.f32.mrf.mxu1  ;;  %v2861_v58 = vadd.f32 %v2860_v63, %v6456_v24  ;;  %4740 = vmatmul.msk.bf16.gmra.mxu1 %vm2441_vm0, %v6253_v40 }
 0x25e   : > { %v2885_v11 = vpop.f32.mrf.mxu3  ;;  %v3233_v60 = vmul.f32 %v6611_v1, %v6611_v1  ;;  %v3235_v17 = vmul.f32 %v6614_v8, %v6614_v8 }
 0x25f   : > { %v2886_v50 = vadd.f32 %v2885_v11, %v2858_v34  ;;  %5130 = vmatmul.lmr.bf16.gmra.8.mxu0  ;;  %3088 = vmatmul.bf16.gmra.mxu2 %v6050_v9 }
 0x260   : > { %v6631_v46 = vadd.f32 %v3235_v17, %v3233_v60 }
 0x261   : > { %v2914_v55 = vadd.f32 %v6555_v30, %v2886_v50 }
 0x263   : > { %5296 = vmatmul.lmr.bf16.gmra.8.mxu3  ;;  %v2942_v54 = vadd.f32 %v6574_v56, %v2914_v55  ;;  %v2862_v62 = vpop.f32.mrf.mxu2  ;;  %v3023_v0 = vpop.f32.mrf.mxu0 }
 0x264   : > { %v2863_v56 = vadd.f32 %v2862_v62, %v6473_v53 }
 0x265   : > { %v2956_v59 = vpop.f32.mrf.mxu1 }
 0x266   : > { %v2888_v45 = vpop.f32.mrf.mxu3 }
 0x267   : > { %v2889_v6 = vadd.f32 %v2888_v45, %v2861_v58  ;;  %5131 = vmatmul.lmr.bf16.gmra.8.mxu0 }
 0x269   : > { %v2917_v26 = vadd.f32 %v6571_v20, %v2889_v6 }
 0x26b   : > { %5297 = vmatmul.lmr.bf16.gmra.8.mxu3  ;;  %v2945_v30 = vadd.f32 %v6580_v29, %v2917_v26  ;;  %v2865_v21 = vpop.f32.mrf.mxu2  ;;  %v3025_v40 = vpop.f32.mrf.mxu0 }
 0x26c   : > { %v2866_v20 = vadd.f32 %v2865_v21, %v6496_v35 }
 0x26d   : > { %v3051_v18 = vpop.f32.mrf.mxu1 }
 0x26e   : > { %v2890_v24 = vpop.f32.mrf.mxu3 }
 0x26f   : > { %v2891_v15 = vadd.f32 %v2890_v24, %v2863_v56  ;;  %5132 = vmatmul.lmr.bf16.gmra.8.mxu0  ;;  %3093 = vmatmul.bf16.gmra.mxu2 %v6115_v38 }
 0x271   : > { %v2919_v32 = vadd.f32 %v6577_v13, %v2891_v15 }
 0x273   : > { %5298 = vmatmul.lmr.bf16.gmra.8.mxu3  ;;  %v2947_v16 = vadd.f32 %v6588_v41, %v2919_v32  ;;  %v2867_v29 = vpop.f32.mrf.mxu2  ;;  %v3028_v9 = vpop.f32.mrf.mxu0 }
 0x274   : > { %v2868_v13 = vadd.f32 %v2867_v29, %v6513_v47 }
 0x275   : > { %v3053_v52 = vpop.f32.mrf.mxu1 }
 0x276   : > { %v2893_v33 = vpop.f32.mrf.mxu3 }
 0x277   : > { %v2894_v49 = vadd.f32 %v2893_v33, %v2866_v20 }
 0x279   : > { %v2922_v53 = vadd.f32 %v6585_v22, %v2894_v49 }
 0x27b   : > { %5299 = vmatmul.lmr.bf16.gmra.8.mxu3  ;;  %v2950_v61 = vadd.f32 %v6594_v27, %v2922_v53  ;;  %v2870_v23 = vpop.f32.mrf.mxu2  ;;  %v3030_v36 = vpop.f32.mrf.mxu0 }
 0x27c   : > { %v2871_v22 = vadd.f32 %v2870_v23, %v6531_v39 }
 0x27d   : > { %v3056_v5 = vpop.f32.mrf.mxu1 }
 0x27e   : > { %v2895_v28 = vpop.f32.mrf.mxu3 }
 0x27f   : > { %v2896_v41 = vadd.f32 %v2895_v28, %v2868_v13 }
 0x281   : > { %v2924_v35 = vadd.f32 %v6592_v25, %v2896_v41 }
 0x283   : > { %5300 = vmatmul.lmr.bf16.gmra.8.mxu3  ;;  %v2952_v42 = vadd.f32 %v6602_v51, %v2924_v35  ;;  %v2872_v12 = vpop.f32.mrf.mxu2  ;;  %v3033_v27 = vpop.f32.mrf.mxu0 }
 0x285   : > { %v3058_v14 = vpop.f32.mrf.mxu1 }
 0x286   : > { %v2898_v44 = vpop.f32.mrf.mxu3 }
 0x287   : > { %v2899_v19 = vadd.f32 %v2898_v44, %v2871_v22 }
 0x289   : > { %v2927_v38 = vadd.f32 %v6599_v43, %v2899_v19 }
 0x28b   : > { %v2955_v47 = vadd.f32 %v2954_v2, %v2927_v38  ;;  %5301 = vmatmul.lmr.bf16.gmra.8.mxu3  ;;  %v2967_v34 = vpop.f32.mrf.mxu2  ;;  %v3035_v25 = vpop.f32.mrf.mxu0 }
 0x28c   : > { %v2968_v11 = vadd.f32 %v2967_v34, %v6605_v3 }
 0x28d   : > { %v3061_v60 = vpop.f32.mrf.mxu1 }
 0x28e   : > { %v2900_v4 = vpop.f32.mrf.mxu3 }
 0x293   : > { %v2969_v63 = vpop.f32.mrf.mxu2  ;;  %v3038_v39 = vpop.f32.mrf.mxu0 }
 0x294   : > { %v2970_v50 = vadd.f32 %v2969_v63, %v2942_v54 }
 0x295   : > { %v3063_v55 = vpop.f32.mrf.mxu1 }
 0x296   : > { %v2995_v17 = vpop.f32.mrf.mxu3 }
 0x297   : > { %v2996_v51 = vadd.f32 %v2995_v17, %v2968_v11 }
 0x299   : > { %v3024_v57 = vadd.f32 %v3023_v0, %v2996_v51 }
 0x29b   : > { %v3052_v58 = vadd.f32 %v3051_v18, %v3024_v57  ;;  %v2972_v62 = vpop.f32.mrf.mxu2  ;;  %v3040_v2 = vpop.f32.mrf.mxu0 }
 0x29c   : > { %v2973_v6 = vadd.f32 %v2972_v62, %v2945_v30 }
 0x29d   : > { %v3066_v59 = vpop.f32.mrf.mxu1 }
 0x29e   : > { %v2997_v45 = vpop.f32.mrf.mxu3 }
 0x29f   : > { %v2998_v43 = vadd.f32 %v2997_v45, %v2970_v50 }
 0x2a1   : > { %v3026_v26 = vadd.f32 %v3025_v40, %v2998_v43 }
 0x2a3   : > { %v3054_v56 = vadd.f32 %v3053_v52, %v3026_v26  ;;  %v2974_v3 = vpop.f32.mrf.mxu2 }
 0x2a4   : > { %v2975_v15 = vadd.f32 %v2974_v3, %v2947_v16 }
 0x2a5   : > { %v3068_v20 = vpop.f32.mrf.mxu1 }
 0x2a6   : > { %v3000_v24 = vpop.f32.mrf.mxu3 }
 0x2a7   : > { %v3001_v21 = vadd.f32 %v3000_v24, %v2973_v6 }
 0x2a9   : > { %v3029_v32 = vadd.f32 %v3028_v9, %v3001_v21 }
 0x2ab   : > { %v3057_v33 = vadd.f32 %v3056_v5, %v3029_v32  ;;  %v2977_v29 = vpop.f32.mrf.mxu2 }
 0x2ac   : > { %v2978_v49 = vadd.f32 %v2977_v29, %v2950_v61 }
 0x2ad   : > { %v3163_v53 = vpop.f32.mrf.mxu1 }
 0x2ae   : > { %v3002_v54 = vpop.f32.mrf.mxu3 }
 0x2af   : > { %v3003_v0 = vadd.f32 %v3002_v54, %v2975_v15 }
 0x2b1   : > { %v3031_v18 = vadd.f32 %v3030_v36, %v3003_v0 }
 0x2b3   : > { %v3059_v13 = vadd.f32 %v3058_v14, %v3031_v18  ;;  %v2979_v30 = vpop.f32.mrf.mxu2 }
 0x2b4   : > { %v2980_v40 = vadd.f32 %v2979_v30, %v2952_v42  ;;  %v3135_v35 = vpop.f32.mrf.mxu0 }
 0x2b5   : > { %v3165_v52 = vpop.f32.mrf.mxu1 }
 0x2b6   : > { %v3005_v28 = vpop.f32.mrf.mxu3 }
 0x2b7   : > { %v3006_v23 = vadd.f32 %v3005_v28, %v2978_v49 }
 0x2b9   : > { %v3034_v41 = vadd.f32 %v3033_v27, %v3006_v23 }
 0x2bb   : > { %v3062_v22 = vadd.f32 %v3061_v60, %v3034_v41  ;;  %v2982_v16 = vpop.f32.mrf.mxu2 }
 0x2bc   : > { %v3137_v19 = vpop.f32.mrf.mxu0  ;;  %v2983_v4 = vadd.f32 %v2982_v16, %v2955_v47 }
 0x2bd   : > { %v3168_v5 = vpop.f32.mrf.mxu1 }
 0x2be   : > { %v3007_v44 = vpop.f32.mrf.mxu3 }
 0x2bf   : > { %v3008_v9 = vadd.f32 %v3007_v44, %v2980_v40 }
 0x2c1   : > { %v3036_v12 = vadd.f32 %v3035_v25, %v3008_v9 }
 0x2c3   : > { %v3064_v38 = vadd.f32 %v3063_v55, %v3036_v12  ;;  %v2984_v36 = vpop.f32.mrf.mxu2 }
 0x2c4   : > { %v3140_v17 = vpop.f32.mrf.mxu0 }
 0x2c5   : > { %v3170_v11 = vpop.f32.mrf.mxu1 }
 0x2c6   : > { %v3010_v61 = vpop.f32.mrf.mxu3 }
 0x2c7   : > { %v3011_v34 = vadd.f32 %v3010_v61, %v2983_v4 }
 0x2c9   : > { %v3039_v14 = vadd.f32 %v3038_v39, %v3011_v34 }
 0x2cb   : > { %v3067_v63 = vadd.f32 %v3066_v59, %v3039_v14  ;;  %v3079_v27 = vpop.f32.mrf.mxu2 }
 0x2cc   : > { %v3142_v50 = vpop.f32.mrf.mxu0  ;;  %v3080_v60 = vadd.f32 %v3079_v27, %v3052_v58 }
 0x2cd   : > { %v3173_v51 = vpop.f32.mrf.mxu1 }
 0x2ce   : > { %v3012_v42 = vpop.f32.mrf.mxu3 }
 0x2d3   : > { %v3081_v45 = vpop.f32.mrf.mxu2 }
 0x2d4   : > { %v3145_v6 = vpop.f32.mrf.mxu0  ;;  %v3082_v47 = vadd.f32 %v3081_v45, %v3054_v56 }
 0x2d5   : > { %v3175_v43 = vpop.f32.mrf.mxu1 }
 0x2d6   : > { %v3107_v57 = vpop.f32.mrf.mxu3 }
 0x2d7   : > { %v3108_v62 = vadd.f32 %v3107_v57, %v3080_v60  ;;  %v3239_v57 = vmul.f32 %v6621_v48, %v6621_v48 }
 0x2d9   : > { %v3136_v25 = vadd.f32 %v3135_v35, %v3108_v62 }
 0x2db   : > { %v6654_v55 = vadd.f32 %v3163_v53, %v3136_v25  ;;  %v3084_v26 = vpop.f32.mrf.mxu2 }
 0x2dc   : > { %v3147_v3 = vpop.f32.mrf.mxu0  ;;  %v3085_v15 = vadd.f32 %v3084_v26, %v3057_v33 }
 0x2dd   : > { %v3178_v59 = vpop.f32.mrf.mxu1  ;;  %v3197_v58 = vsel %vm3196_vm2, %v6654_v55, 0.0 }
 0x2de   : > { %v3109_v2 = vpop.f32.mrf.mxu3 }
 0x2df   : > { %v3110_v39 = vadd.f32 %v3109_v2, %v3082_v47  ;;  %v3241_v2 = vmul.f32 %v6623_v31, %v6623_v31 }
 0x2e1   : > { %v3138_v24 = vadd.f32 %v3137_v19, %v3110_v39 }
 0x2e3   : > { %v6656_v21 = vadd.f32 %v3165_v52, %v3138_v24  ;;  %v3086_v29 = vpop.f32.mrf.mxu2 }
 0x2e4   : > { %v3150_v18 = vpop.f32.mrf.mxu0  ;;  %v3087_v28 = vadd.f32 %v3086_v29, %v3059_v13 }
 0x2e5   : > { %v3198_v32 = vsel %vm3196_vm2, %v6656_v21, 0.0  ;;  %v3180_v49 = vpop.f32.mrf.mxu1 }
 0x2e6   : > { %v3199_v20 = vadd.f32 %v3198_v32, %v3197_v58  ;;  %v3112_v54 = vpop.f32.mrf.mxu3 }
 0x2e7   : > { %v3113_v56 = vadd.f32 %v3112_v54, %v3085_v15 }
 0x2e9   : > { %v3141_v0 = vadd.f32 %v3140_v17, %v3113_v56 }
 0x2eb   : > { %v3169_v53 = vadd.f32 %v3168_v5, %v3141_v0  ;;  %v3089_v41 = vpop.f32.mrf.mxu2 }
 0x2ec   : > { %v3152_v33 = vpop.f32.mrf.mxu0  ;;  %v3090_v16 = vadd.f32 %v3089_v41, %v3062_v22 }
 0x2ed   : > { %v3200_v30 = vsel %vm3196_vm2, %v3169_v53, 0.0 }
 0x2ee   : > { %v3201_v23 = vadd.f32 %v3200_v30, %v3199_v20  ;;  %v3114_v40 = vpop.f32.mrf.mxu3 }
 0x2ef   : > { %v3115_v52 = vadd.f32 %v3114_v40, %v3087_v28 }
 0x2f1   : > { %v3143_v35 = vadd.f32 %v3142_v50, %v3115_v52  ;;  %v3237_v50 = vmul.f32 %v6617_v37, %v6617_v37 }
 0x2f3   : > { %v3171_v44 = vadd.f32 %v3170_v11, %v3143_v35  ;;  %v3091_v4 = vpop.f32.mrf.mxu2  ;;  %v3248_v22 = vadd.f32 %v6631_v46, %v3237_v50  ;;  %v3243_v46 = vmul.f32 %v6625_v7, %v6625_v7 }
 0x2f4   : > { %v3092_v5 = vadd.f32 %v3091_v4, %v3064_v38 }
 0x2f5   : > { %v3202_v9 = vsel %vm3196_vm2, %v3171_v44, 0.0  ;;  %v3249_v38 = vadd.f32 %v3248_v22, %v3239_v57 }
 0x2f6   : > { %v3203_v12 = vadd.f32 %v3202_v9, %v3201_v23  ;;  %v3117_v19 = vpop.f32.mrf.mxu3 }
 0x2f7   : > { %v3118_v61 = vadd.f32 %v3117_v19, %v3090_v16  ;;  %v3250_v39 = vadd.f32 %v3249_v38, %v3241_v2 }
 0x2f9   : > { %v3146_v36 = vadd.f32 %v3145_v6, %v3118_v61 }
 0x2fb   : > { %v3174_v34 = vadd.f32 %v3173_v51, %v3146_v36  ;;  %v3094_v42 = vpop.f32.mrf.mxu2 }
 0x2fc   : > { %v3095_v45 = vadd.f32 %v3094_v42, %v3067_v63  ;;  %v3245_v63 = vmul.f32 %v6607_v10, %v6607_v10 }
 0x2fd   : > { %v3204_v13 = vsel %vm3196_vm2, %v3174_v34, 0.0 }
 0x2fe   : > { %v3205_v14 = vadd.f32 %v3204_v13, %v3203_v12  ;;  %v3119_v17 = vpop.f32.mrf.mxu3  ;;  %v3252_v32 = vsel %vm3187_vm1, %v3245_v63, 0.0 }
 0x2ff   : > { %v3120_v27 = vadd.f32 %v3119_v17, %v3092_v5 }
 0x301   : > { %v3148_v11 = vadd.f32 %v3147_v3, %v3120_v27  ;;  %v3251_v3 = vadd.f32 %v3250_v39, %v3243_v46 }
 0x303   : > { %v3176_v60 = vadd.f32 %v3175_v43, %v3148_v11  ;;  %v3096_v6 = vpop.f32.mrf.mxu2  ;;  %v3253_v54 = vadd.f32 %v3252_v32, %v3251_v3 }
 0x305   : > { %v3206_v51 = vsel %vm3196_vm2, %v3176_v60, 0.0  ;;  %v3254_v0 = vrot.slane %v3253_v54, 4 }
 0x306   : > { %v3207_v62 = vadd.f32 %v3206_v51, %v3205_v14  ;;  %v3122_v25 = vpop.f32.mrf.mxu3 }
 0x307   : > { %v3123_v47 = vadd.f32 %v3122_v25, %v3095_v45 }
 0x309   : > { %v3151_v26 = vadd.f32 %v3150_v18, %v3123_v47  ;;  %v3255_v18 = vadd.f32 %v3254_v0, %v3253_v54 }
 0x30b   : > { %v3179_v24 = vadd.f32 %v3178_v59, %v3151_v26  ;;  %v3256_v23 = vrot.slane %v3255_v18, 2 }
 0x30d   : > { %v3209_v43 = vsel %vm3208_vm3, %v3179_v24, 0.0  ;;  %v3257_v19 = vadd.f32 %v3256_v23, %v3255_v18  ;;  %v4741_v23 = vld [vmem:[%s185_s9 + $0x1] ss:$2 sm:$0x3] }
 0x30e   : > { %v3210_v58 = vadd.f32 %v3209_v43, %v3207_v62  ;;  %v3124_v15 = vpop.f32.mrf.mxu3 }
 0x30f   : > { %v3258_v13 = vrot.slane %v3257_v19, 1 }
 0x310   : > { %v3211_v20 = vrot.slane %v3210_v58, 4 }
 0x311   : > { %v3259_v22 = vadd.f32 %v3258_v13, %v3257_v19  ;;  %v3332_v19 = vperm.slane %v4741_v23, 0 }
 0x312   : > { %v3212_v29 = vadd.f32 %v3211_v20, %v3210_v58 }
 0x313   : > { %v3279_v38 = vmul.f32 0.020408163, %v3259_v22 }
 0x314   : > { %v3213_v56 = vrot.slane %v3212_v29, 2 }
 0x315   : > { %v3284_v6 = vadd.f32 1e-05, %v3279_v38 }
 0x316   : > { %v3214_v49 = vadd.f32 %v3213_v56, %v3212_v29 }
 0x317   : > { %5361 = vrsqrt.f32 %v3284_v6  ;;  %vm3292_vm8 = vweird.f32 %v3284_v6 }
 0x318   : > { %v3215_v59 = vrot.slane %v3214_v49, 1 }
 0x31a   : > { %v3216_v28 = vadd.f32 %v3215_v59, %v3214_v49 }
 0x31c   : > { %v3218_v30 = vmul.f32 0.020408163, %v3216_v28  ;;  %v3281_v28 = vld [vmem:[%s185_s9] ss:$2 sm:$0x3] }
 0x31e   : > { %v6680_v40 = vsub.f32 %v6654_v55, %v3218_v30  ;;  %v6683_v41 = vsub.f32 %v6656_v21, %v3218_v30  ;;  %v6685_v52 = vsub.f32 %v3169_v53, %v3218_v30  ;;  %v6687_v35 = vsub.f32 %v3171_v44, %v3218_v30 }
 0x31f   : > { %v6689_v33 = vsub.f32 %v3174_v34, %v3218_v30  ;;  %v6691_v16 = vsub.f32 %v3176_v60, %v3218_v30  ;;  %v6693_v9 = vsub.f32 %v3179_v24, %v3218_v30  ;;  %v5362_v24 = vpop.eup %5361 }
 0x320   : > { %v3234_v12 = vmul.f32 %v6680_v40, %v6680_v40  ;;  %v3236_v55 = vmul.f32 %v6683_v41, %v6683_v41  ;;  %v3238_v21 = vmul.f32 %v6685_v52, %v6685_v52  ;;  %v3240_v53 = vmul.f32 %v6687_v35, %v6687_v35 }
 0x321   : > { %v3242_v36 = vmul.f32 %v6689_v33, %v6689_v33  ;;  %v3244_v14 = vmul.f32 %v6691_v16, %v6691_v16  ;;  %v3246_v27 = vmul.f32 %v6693_v9, %v6693_v9  ;;  %v3287_v43 = vmul.f32 %v5362_v24, %v3284_v6 }
 0x322   : > { %v3260_v44 = vsel %vm3196_vm2, %v3234_v12, 0.0  ;;  %v3261_v4 = vsel %vm3196_vm2, %v3236_v55, 0.0  ;;  %v3263_v34 = vsel %vm3196_vm2, %v3238_v21, 0.0  ;;  %v3265_v17 = vsel %vm3196_vm2, %v3240_v53, 0.0 }
 0x323   : > { %v3262_v61 = vadd.f32 %v3261_v4, %v3260_v44  ;;  %v3267_v50 = vsel %vm3196_vm2, %v3242_v36, 0.0  ;;  %v3269_v60 = vsel %vm3196_vm2, %v3244_v14, 0.0  ;;  %v3271_v45 = vsel %vm3208_vm3, %v3246_v27, 0.0 }
 0x324   : > { %v3288_v3 = vmul.f32 %v5362_v24, %v3287_v43  ;;  %vm3293_vm6 = vweird.f32 %v5362_v24  ;;  %v3333_v44 = vperm.slane %v4741_v23, 1 }
 0x325   : > { %v3264_v5 = vadd.f32 %v3263_v34, %v3262_v61  ;;  %vm3294_vm9 = vmor %vm3292_vm8, %vm3293_vm6 }
 0x326   : > { %v3289_v32 = vmul.f32 0.5, %v3288_v3 }
 0x327   : > { %v3266_v42 = vadd.f32 %v3265_v17, %v3264_v5 }
 0x328   : > { %v3290_v29 = vsub.f32 1.5, %v3289_v32 }
 0x329   : > { %v3268_v11 = vadd.f32 %v3267_v50, %v3266_v42 }
 0x32a   : > { %v3291_v49 = vmul.f32 %v5362_v24, %v3290_v29 }
 0x32b   : > { %v3270_v57 = vadd.f32 %v3269_v60, %v3268_v11 }
 0x32c   : > { %v3295_v30 = vsel %vm3294_vm9, %v5362_v24, %v3291_v49 }
 0x32d   : > { %v3272_v51 = vadd.f32 %v3271_v45, %v3270_v57 }
 0x32f   : > { %v3273_v62 = vrot.slane %v3272_v51, 4 }
 0x331   : > { %v3274_v25 = vadd.f32 %v3273_v62, %v3272_v51 }
 0x333   : > { %v3275_v47 = vrot.slane %v3274_v25, 2 }
 0x335   : > { %v3276_v2 = vadd.f32 %v3275_v47, %v3274_v25 }
 0x337   : > { %v3277_v26 = vrot.slane %v3276_v2, 1 }
 0x339   : > { %v3278_v39 = vadd.f32 %v3277_v26, %v3276_v2 }
 0x33b   : > { %v3280_v46 = vmul.f32 0.020408163, %v3278_v39 }
 0x33d   : > { %v3285_v63 = vadd.f32 1e-05, %v3280_v46 }
 0x33f   : > { %5363 = vrsqrt.f32 %v3285_v63  ;;  %vm3302_vm5 = vweird.f32 %v3285_v63 }
 0x345   : > { %v5364_v58 = vpop.eup %5363 }
 0x346   : > { %v3297_v15 = vmul.f32 %v5364_v58, %v3285_v63  ;;  %vm3303_vm4 = vweird.f32 %v5364_v58 }
 0x347   : > { %vm3304_vm7 = vmor %vm3302_vm5, %vm3303_vm4 }
 0x348   : > { %v3298_v20 = vmul.f32 %v5364_v58, %v3297_v15 }
 0x34a   : > { %v3299_v54 = vmul.f32 0.5, %v3298_v20 }
 0x34c   : > { %v3300_v56 = vsub.f32 1.5, %v3299_v54 }
 0x34e   : > { %v3301_v0 = vmul.f32 %v5364_v58, %v3300_v56 }
 0x350   : > { %v3305_v59 = vsel %vm3304_vm7, %v5364_v58, %v3301_v0 }
 0x351   : > { %v3308_v18 = vrot.slane %v3305_v59, 7 }
 0x353   : > { %v3309_v12 = vsel %vm3187_vm1, %v3295_v30, %v3308_v18 }
 0x354   : > { %v3311_v55 = vmul.f32 %v3309_v12, %v3281_v28 }
 0x356   : > { %v3313_v21 = vperm.slane %v3311_v55, 0  ;;  %v3314_v53 = vperm.slane %v3311_v55, 1 }
 0x358   : > { %v3317_v4 = vmul.f32 %v3313_v21, %v6611_v1  ;;  %v3319_v61 = vmul.f32 %v3313_v21, %v6614_v8  ;;  %v3318_v36 = vmul.f32 %v3314_v53, %v6680_v40  ;;  %v3320_v13 = vmul.f32 %v3314_v53, %v6683_v41 }
 0x359   : > { %v3322_v14 = vmul.f32 %v3314_v53, %v6685_v52  ;;  %v3324_v17 = vmul.f32 %v3314_v53, %v6687_v35  ;;  %v3326_v42 = vmul.f32 %v3314_v53, %v6689_v33  ;;  %v3328_v27 = vmul.f32 %v3314_v53, %v6691_v16 }
 0x35a   : > { %v3336_v34 = vadd.f32 %v3332_v19, %v3317_v4  ;;  %v3337_v5 = vadd.f32 %v3333_v44, %v3318_v36  ;;  %v3330_v50 = vmul.f32 %v3314_v53, %v6693_v9  ;;  %v3339_v1 = vadd.f32 %v3333_v44, %v3320_v13 }
 0x35b   : > { %v3341_v11 = vadd.f32 %v3333_v44, %v3322_v14  ;;  %v3343_v8 = vadd.f32 %v3333_v44, %v3324_v17  ;;  %v3345_v22 = vadd.f32 %v3333_v44, %v3326_v42  ;;  %v3347_v40 = vadd.f32 %v3333_v44, %v3328_v27 }
 0x35c   : > { %3350 = vxpose.xlu2.b32.start [1/7] (short) %v3336_v34, 128  ;;  %v3349_v60 = vadd.f32 %v3333_v44, %v3330_v50  ;;  %v3338_v57 = vadd.f32 %v3332_v19, %v3319_v61  ;;  %v3321_v41 = vmul.f32 %v3313_v21, %v6617_v37  ;;  %v3323_v52 = vmul.f32 %v3313_v21, %v6621_v48 }
 0x35d   : > { %v3325_v33 = vmul.f32 %v3313_v21, %v6623_v31  ;;  %v3327_v9 = vmul.f32 %v3313_v21, %v6625_v7  ;;  %v3329_v38 = vmul.f32 %v3313_v21, %v6607_v10 }
 0x35e   : > { %v3340_v45 = vadd.f32 %v3332_v19, %v3321_v41  ;;  %v3342_v35 = vadd.f32 %v3332_v19, %v3323_v52 }
 0x35f   : > { %v3344_v16 = vadd.f32 %v3332_v19, %v3325_v33  ;;  %v3346_v51 = vadd.f32 %v3332_v19, %v3327_v9  ;;  %v3348_v62 = vadd.f32 %v3332_v19, %v3329_v38 }
 0x364   : > { %3351 = vxpose.xlu2.b32.cont [2/7] (short) %v3338_v57, 128 }
 0x36c   : > { %3352 = vxpose.xlu2.b32.cont [3/7] (short) %v3340_v45, 128 }
 0x374   : > { %3353 = vxpose.xlu2.b32.cont [4/7] (short) %v3342_v35, 128 }
 0x37c   : > { %3354 = vxpose.xlu2.b32.cont [5/7] (short) %v3344_v16, 128 }
 0x384   : > { %3355 = vxpose.xlu2.b32.cont [6/7] (short) %v3346_v51, 128 }
 0x38c   : > { %3356 = vxpose.xlu2.b32.end [7/7] (short) %v3348_v62, 128 }
 0x3dc   : > { %3382 = vxpose.xlu2.b32.start [1/7] (short) (narrow) %v3337_v5, 8 }
 0x3e4   : > { %3383 = vxpose.xlu2.b32.cont [2/7] (short) (narrow) %v3339_v1, 8 }
 0x3ec   : > { %3384 = vxpose.xlu2.b32.cont [3/7] (short) (narrow) %v3341_v11, 8 }
 0x3f4   : > { %3385 = vxpose.xlu2.b32.cont [4/7] (short) (narrow) %v3343_v8, 8 }
 0x3f5   : > { %v3366_v10 = vpop.trf.xlu2 }
 0x3f6   : > { %3415 = vst.msk [vmem:[%s6739_s16] sm:$0xff] %vm3414_vm10, %v3366_v10 }
 0x3fc   : > { %3386 = vxpose.xlu2.b32.cont [5/7] (short) (narrow) %v3345_v22, 8 }
 0x3fd   : > { %v3367_v37 = vpop.trf.xlu2 }
 0x3fe   : > { %3416 = vst.msk [vmem:[%s6739_s16 + $0x8] sm:$0xff] %vm3414_vm10, %v3367_v37 }
 0x404   : > { %3387 = vxpose.xlu2.b32.cont [6/7] (short) (narrow) %v3347_v40, 8 }
 0x405   : > { %v3368_v48 = vpop.trf.xlu2 }
 0x406   : > { %3417 = vst.msk [vmem:[%s6739_s16 + $0x10] sm:$0xff] %vm3414_vm10, %v3368_v48 }
 0x40c   : > { %3388 = vxpose.xlu2.b32.end [7/7] (short) (narrow) %v3349_v60, 8 }
 0x40d   : > { %v3369_v31 = vpop.trf.xlu2 }
 0x40e   : > { %3418 = vst.msk [vmem:[%s6739_s16 + $0x18] sm:$0xff] %vm3414_vm10, %v3369_v31 }
 0x415   : > { %v3370_v7 = vpop.trf.xlu2 }
 0x416   : > { %3419 = vst.msk [vmem:[%s6739_s16 + $0x20] sm:$0xff] %vm3414_vm10, %v3370_v7 }
 0x41d   : > { %v3371_v25 = vpop.trf.xlu2 }
 0x41e   : > { %3420 = vst.msk [vmem:[%s6739_s16 + $0x28] sm:$0xff] %vm3414_vm10, %v3371_v25 }
 0x425   : > { %v3372_v6 = vpop.trf.xlu2 }
 0x426   : > { %3421 = vst.msk [vmem:[%s6739_s16 + $0x30] sm:$0xff] %vm3414_vm10, %v3372_v6 }
 0x42d   : > { %v3373_v47 = vpop.trf.xlu2 }
 0x42e   : > { %3422 = vst.msk [vmem:[%s6739_s16 + $0x38] sm:$0xff] %vm3414_vm10, %v3373_v47 }
 0x435   : > { %v3374_v2 = vpop.trf.xlu2 }
 0x436   : > { %3423 = vst.msk [vmem:[%s6739_s16 + $0x40] sm:$0xff] %vm3414_vm10, %v3374_v2 }
 0x43d   : > { %v3375_v26 = vpop.trf.xlu2 }
 0x43e   : > { %3424 = vst.msk [vmem:[%s6739_s16 + $0x48] sm:$0xff] %vm3414_vm10, %v3375_v26 }
 0x445   : > { %v3376_v39 = vpop.trf.xlu2 }
 0x446   : > { %3425 = vst.msk [vmem:[%s6739_s16 + $0x50] sm:$0xff] %vm3414_vm10, %v3376_v39 }
 0x44d   : > { %v3377_v24 = vpop.trf.xlu2 }
 0x44e   : > { %3426 = vst.msk [vmem:[%s6739_s16 + $0x58] sm:$0xff] %vm3414_vm10, %v3377_v24 }
 0x455   : > { %v3378_v46 = vpop.trf.xlu2 }
 0x456   : > { %3427 = vst.msk [vmem:[%s6739_s16 + $0x60] sm:$0xff] %vm3414_vm10, %v3378_v46 }
 0x45d   : > { %v3379_v63 = vpop.trf.xlu2 }
 0x45e   : > { %3428 = vst.msk [vmem:[%s6739_s16 + $0x68] sm:$0xff] %vm3414_vm10, %v3379_v63 }
 0x465   : > { %v3380_v43 = vpop.trf.xlu2 }
 0x466   : > { %3429 = vst.msk [vmem:[%s6739_s16 + $0x70] sm:$0xff] %vm3414_vm10, %v3380_v43 }
 0x46d   : > { %v3381_v3 = vpop.trf.xlu2 }
 0x46e   : > { %3430 = vst.msk [vmem:[%s6739_s16 + $0x78] sm:$0xff] %vm3414_vm10, %v3381_v3 }
 0x475   : > { %v3398_v58 = vpop.trf.xlu2 }
 0x476   : > { %3431 = vst.msk [vmem:[%s6739_s16 + $0x80] sm:$0xff] %vm3414_vm10, %v3398_v58 }
 0x477 PF: > { %s13_s12 = sadd.s32 1, %s5381_s12  }
 0x478   : > { %p10_p5 = scmp.ge.s32.totalorder %s13_s12, 4  }
 0x47a   :  { %12 = sbr.rel (!%p10_p5) target bundleno = 1 (0x1), region = 66 }

</bundles_post_ra>
